<compile_context>
chip_gen: v6e
topology: v6e:2x2x1
jax: 0.10.0
libtpu: 0.0.40
codegen_flags: <defaults>
</compile_context>

<pallas_src>
import jax
import jax.numpy as jnp
from jax.experimental import pallas as pl
from jax.experimental.pallas import tpu as pltpu


def linear_self_attention_kernel(x_ref, wq_ref, wk_ref, bk_ref,
                                 wv_ref, bv_ref, wo_ref, bo_ref, o_ref):
    P, N, C = x_ref.shape

    x = x_ref[...].astype(jnp.float32)          # (P, N, C)
    # Leading-dim merge: free when N is a multiple of 8 (sublane), which holds
    # for MobileViT-v2 patch counts (64 / 256 / 1024) and the demo shapes.
    x2 = x.reshape(P * N, C)
    x_bf = x2.astype(jnp.bfloat16)

    # --- qkv projection ------------------------------------------------------
    # query (single output channel): VPU multiply + lane reduce, not a matmul.
    # NOTE: the query bias bq is intentionally omitted -- softmax over N is
    # shift-invariant, so a scalar bias on the 1-channel query is a no-op.
    q = jnp.sum(x * wq_ref[...].astype(jnp.float32), axis=-1, keepdims=True)   # (P, N, 1)

    k = (jnp.dot(x_bf, wk_ref[...].astype(jnp.bfloat16),
                 preferred_element_type=jnp.float32) + bk_ref[...])            # (P*N, C)
    v = (jnp.dot(x_bf, wv_ref[...].astype(jnp.bfloat16),
                 preferred_element_type=jnp.float32) + bv_ref[...])            # (P*N, C)
    k = k.reshape(P, N, C)
    v = v.reshape(P, N, C)

    # --- linear attention ----------------------------------------------------
    # softmax over the patch axis N (per b, p); normalization folded into ctx.
    q_max = jnp.max(q, axis=1, keepdims=True)                                  # (P, 1, 1)
    e = jnp.exp(q - q_max)                                                     # (P, N, 1)
    inv_denom = pl.reciprocal(jnp.sum(e, axis=1, keepdims=True), approx=True)  # (P, 1, 1) EUP
    # TODO(synk): attn_dropout omitted (p=0.0 default / eval mode -> identity).
    ctx = jnp.sum(k * e, axis=1, keepdims=True) * inv_denom                    # (P, 1, C)

    out = jnp.maximum(v, 0.0) * ctx                                            # (P, N, C)

    # --- output projection ---------------------------------------------------
    y = (jnp.dot(out.reshape(P * N, C).astype(jnp.bfloat16),
                 wo_ref[...].astype(jnp.bfloat16),
                 preferred_element_type=jnp.float32) + bo_ref[...])            # (P*N, C)
    o_ref[...] = y.reshape(P, N, C).astype(o_ref.dtype)


def linear_self_attention(x_bpnc, params):
    """x_bpnc: (B, P, N, C) channels-last input. Returns (B, P, N, C)."""
    B, P, N, C = x_bpnc.shape
    wq, bq, wk, bk, wv, bv, wo, bo = params
    del bq                      # softmax shift-invariance: never enters kernel
    wq_row = wq.reshape(1, C)   # (C, 1) -> (1, C) row for the VPU reduce

    def resident(w):
        # Constant index map: DMA'd once, stays resident in VMEM across steps.
        return pl.BlockSpec(w.shape, lambda b: (0,) * w.ndim)

    # Whole (P, N, C) slab per batch element; last two dims equal the full
    # array dims so the (8, 128) tiling rule is trivially satisfied.
    # (If profiles show exposed input DMA, add pipeline_mode=pl.Buffered(3).)
    x_spec = pl.BlockSpec((None, P, N, C), lambda b: (b, 0, 0, 0))

    grid_spec = pltpu.PrefetchScalarGridSpec(
        num_scalar_prefetch=0,
        grid=(B,),
        in_specs=[
            x_spec,
            resident(wq_row),
            resident(wk), resident(bk),
            resident(wv), resident(bv),
            resident(wo), resident(bo),
        ],
        out_specs=pl.BlockSpec((None, P, N, C), lambda b: (b, 0, 0, 0)),
    )

    return pl.pallas_call(
        linear_self_attention_kernel,
        out_shape=jax.ShapeDtypeStruct((B, P, N, C), x_bpnc.dtype),
        grid_spec=grid_spec,
        compiler_params=pltpu.CompilerParams(
            dimension_semantics=("parallel",)),
    )(x_bpnc, wq_row, wk, bk, wv, bv, wo, bo)


def reference(x_bpnc, params):
    """Pure-JAX f32 reference of the PyTorch forward (channels-last layout)."""
    wq, bq, wk, bk, wv, bv, wo, bo = params
    x = x_bpnc.astype(jnp.float32)
    q = jnp.einsum('bpnc,cq->bpnq', x, wq) + bq          # (B, P, N, 1)
    k = jnp.einsum('bpnc,cd->bpnd', x, wk) + bk          # (B, P, N, C)
    v = jnp.einsum('bpnc,cd->bpnd', x, wv) + bv          # (B, P, N, C)
    scores = jax.nn.softmax(q, axis=2)                   # softmax over N
    ctx = jnp.sum(k * scores, axis=2, keepdims=True)     # (B, P, 1, C)
    out = jax.nn.relu(v) * ctx
    return jnp.einsum('bpnc,cd->bpnd', out, wo) + bo


if __name__ == "__main__":
    key = jax.random.PRNGKey(0)
    # Small but representative MobileViT-v2 attention shapes:
    # batch, embed_dim (lane-dense C), pixels-per-patch, num-patches.
    B, C, P, N = 2, 128, 4, 64

    kx, kw = jax.random.split(key)
    # PyTorch-convention NCHW input (B, C, P, N)
    x_nchw = jax.random.normal(kx, (B, C, P, N), dtype=jnp.float32)
    # kernel layout: channels-last (B, P, N, C)
    x_bpnc = jnp.transpose(x_nchw, (0, 2, 3, 1))

    # Deterministic parameter init (1x1 conv weights stored as (Cin, Cout)):
    # qkv_proj weight (1 + 2C, C, 1, 1) split into wq (C,1), wk (C,C), wv (C,C).
    ks = jax.random.split(kw, 8)
    scale = 1.0 / float(C) ** 0.5
    wq = jax.random.uniform(ks[0], (C, 1), jnp.float32, -scale, scale)
    bq = jax.random.uniform(ks[1], (1, 1), jnp.float32, -scale, scale)
    wk = jax.random.uniform(ks[2], (C, C), jnp.float32, -scale, scale)
    bk = jax.random.uniform(ks[3], (1, C), jnp.float32, -scale, scale)
    wv = jax.random.uniform(ks[4], (C, C), jnp.float32, -scale, scale)
    bv = jax.random.uniform(ks[5], (1, C), jnp.float32, -scale, scale)
    wo = jax.random.uniform(ks[6], (C, C), jnp.float32, -scale, scale)
    bo = jax.random.uniform(ks[7], (1, C), jnp.float32, -scale, scale)
    params = (wq, bq, wk, bk, wv, bv, wo, bo)

    y = linear_self_attention(x_bpnc, params)
    y = jax.block_until_ready(y)

    y_ref = reference(x_bpnc, params)          # full-f32 module reference
    # Output back in the module's NCHW convention: (B, C, P, N)
    y_nchw = jnp.transpose(y, (0, 3, 1, 2))
    assert y_nchw.shape == (B, C, P, N)

    max_err = float(jnp.max(jnp.abs(y.astype(jnp.float32) - y_ref)))
    # Tolerance accounts for bf16 MXU operands + approx reciprocal in-kernel
    # vs. the pure-f32 reference (observed error is ~1e-3 level).
    assert jnp.allclose(y, y_ref, atol=1e-2, rtol=1e-2), (
        f"mismatch vs JAX reference (max abs err {max_err:.2e})")

    print("KERNEL_OK")
</pallas_src>

<mosaic_0001>
module attributes {stable_mosaic.version = 11 : i64} {
  func.func @linear_self_attention_kernel(%arg0: i32, %arg1: memref<1x4x64x128xf32, #tpu.memory_space<vmem>>, %arg2: memref<1x128xf32, #tpu.memory_space<vmem>>, %arg3: memref<128x128xf32, #tpu.memory_space<vmem>>, %arg4: memref<1x128xf32, #tpu.memory_space<vmem>>, %arg5: memref<128x128xf32, #tpu.memory_space<vmem>>, %arg6: memref<1x128xf32, #tpu.memory_space<vmem>>, %arg7: memref<128x128xf32, #tpu.memory_space<vmem>>, %arg8: memref<1x128xf32, #tpu.memory_space<vmem>>, %arg9: memref<1x4x64x128xf32, #tpu.memory_space<vmem>>) attributes {dimension_semantics = [#tpu.dimension_semantics<parallel>], iteration_bounds = array<i64: 2>, scalar_prefetch = 0 : i64, scratch_operands = 0 : i64, tpu.core_type = #tpu.core_type<tc>, window_params = [{transform_indices = @transform_0, window_bounds = array<i64: 1, 4, 64, 128>}, {pipeline_mode = #tpu.pipeline_mode<synchronous>, transform_indices = @transform_1, window_bounds = array<i64: 1, 128>}, {pipeline_mode = #tpu.pipeline_mode<synchronous>, transform_indices = @transform_2, window_bounds = array<i64: 128, 128>}, {pipeline_mode = #tpu.pipeline_mode<synchronous>, transform_indices = @transform_3, window_bounds = array<i64: 1, 128>}, {pipeline_mode = #tpu.pipeline_mode<synchronous>, transform_indices = @transform_4, window_bounds = array<i64: 128, 128>}, {pipeline_mode = #tpu.pipeline_mode<synchronous>, transform_indices = @transform_5, window_bounds = array<i64: 1, 128>}, {pipeline_mode = #tpu.pipeline_mode<synchronous>, transform_indices = @transform_6, window_bounds = array<i64: 128, 128>}, {pipeline_mode = #tpu.pipeline_mode<synchronous>, transform_indices = @transform_7, window_bounds = array<i64: 1, 128>}, {transform_indices = @transform_8, window_bounds = array<i64: 1, 4, 64, 128>}]} {
    %c0 = arith.constant 0 : index
    %c0_0 = arith.constant 0 : index
    %c0_1 = arith.constant 0 : index
    %c0_2 = arith.constant 0 : index
    %0 = vector.load %arg1[%c0, %c0_0, %c0_1, %c0_2] : memref<1x4x64x128xf32, #tpu.memory_space<vmem>>, vector<1x4x64x128xf32>
    %1 = vector.shape_cast %0 : vector<1x4x64x128xf32> to vector<4x64x128xf32>
    %2 = vector.shape_cast %1 : vector<4x64x128xf32> to vector<256x128xf32>
    %3 = arith.truncf %2 : vector<256x128xf32> to vector<256x128xbf16>
    %c0_3 = arith.constant 0 : index
    %c0_4 = arith.constant 0 : index
    %4 = vector.load %arg2[%c0_3, %c0_4] : memref<1x128xf32, #tpu.memory_space<vmem>>, vector<1x128xf32>
    %5 = vector.shape_cast %4 : vector<1x128xf32> to vector<1x1x128xf32>
    %6 = vector.broadcast %5 : vector<1x1x128xf32> to vector<4x64x128xf32>
    %7 = arith.mulf %1, %6 : vector<4x64x128xf32>
    %cst = arith.constant dense<0.000000e+00> : vector<4x64xf32>
    %8 = vector.multi_reduction <add>, %7, %cst [2] : vector<4x64x128xf32> to vector<4x64xf32>
    %9 = vector.shape_cast %8 : vector<4x64xf32> to vector<4x64x1xf32>
    %c0_5 = arith.constant 0 : index
    %c0_6 = arith.constant 0 : index
    %10 = vector.load %arg3[%c0_5, %c0_6] : memref<128x128xf32, #tpu.memory_space<vmem>>, vector<128x128xf32>
    %11 = arith.truncf %10 : vector<128x128xf32> to vector<128x128xbf16>
    %cst_7 = arith.constant dense<0.000000e+00> : vector<256x128xf32>
    %12 = tpu.matmul %3, %11, %cst_7 {dimension_numbers = #tpu.dot_dimension_numbers<[1], [0], [0], [1], [0, 0, 1, 1], [], []>} : vector<256x128xbf16>, vector<128x128xbf16>, vector<256x128xf32> -> vector<256x128xf32>
    %c0_8 = arith.constant 0 : index
    %c0_9 = arith.constant 0 : index
    %13 = vector.load %arg4[%c0_8, %c0_9] : memref<1x128xf32, #tpu.memory_space<vmem>>, vector<1x128xf32>
    %14 = vector.broadcast %13 : vector<1x128xf32> to vector<256x128xf32>
    %15 = arith.addf %12, %14 : vector<256x128xf32>
    %c0_10 = arith.constant 0 : index
    %c0_11 = arith.constant 0 : index
    %16 = vector.load %arg5[%c0_10, %c0_11] : memref<128x128xf32, #tpu.memory_space<vmem>>, vector<128x128xf32>
    %17 = arith.truncf %16 : vector<128x128xf32> to vector<128x128xbf16>
    %cst_12 = arith.constant dense<0.000000e+00> : vector<256x128xf32>
    %18 = tpu.matmul %3, %17, %cst_12 {dimension_numbers = #tpu.dot_dimension_numbers<[1], [0], [0], [1], [0, 0, 1, 1], [], []>} : vector<256x128xbf16>, vector<128x128xbf16>, vector<256x128xf32> -> vector<256x128xf32>
    %c0_13 = arith.constant 0 : index
    %c0_14 = arith.constant 0 : index
    %19 = vector.load %arg6[%c0_13, %c0_14] : memref<1x128xf32, #tpu.memory_space<vmem>>, vector<1x128xf32>
    %20 = vector.broadcast %19 : vector<1x128xf32> to vector<256x128xf32>
    %21 = arith.addf %18, %20 : vector<256x128xf32>
    %22 = vector.shape_cast %15 : vector<256x128xf32> to vector<4x64x128xf32>
    %23 = vector.shape_cast %21 : vector<256x128xf32> to vector<4x64x128xf32>
    %cst_15 = arith.constant dense<0xFF800000> : vector<4x1xf32>
    %24 = vector.multi_reduction <maximumf>, %9, %cst_15 [1] : vector<4x64x1xf32> to vector<4x1xf32>
    %25 = vector.shape_cast %24 : vector<4x1xf32> to vector<4x1x1xf32>
    %26 = vector.broadcast %25 : vector<4x1x1xf32> to vector<4x64x1xf32>
    %27 = arith.subf %9, %26 : vector<4x64x1xf32>
    %28 = math.exp %27 : vector<4x64x1xf32>
    %cst_16 = arith.constant dense<0.000000e+00> : vector<4x1xf32>
    %29 = vector.multi_reduction <add>, %28, %cst_16 [1] : vector<4x64x1xf32> to vector<4x1xf32>
    %30 = vector.shape_cast %29 : vector<4x1xf32> to vector<4x1x1xf32>
    %31 = tpu.reciprocal %30 {approx = true} : vector<4x1x1xf32> -> vector<4x1x1xf32>
    %32 = vector.broadcast %28 : vector<4x64x1xf32> to vector<4x64x128xf32>
    %33 = arith.mulf %22, %32 : vector<4x64x128xf32>
    %cst_17 = arith.constant dense<0.000000e+00> : vector<4x128xf32>
    %34 = vector.multi_reduction <add>, %33, %cst_17 [1] : vector<4x64x128xf32> to vector<4x128xf32>
    %35 = vector.shape_cast %34 : vector<4x128xf32> to vector<4x1x128xf32>
    %36 = vector.broadcast %31 : vector<4x1x1xf32> to vector<4x1x128xf32>
    %37 = arith.mulf %35, %36 : vector<4x1x128xf32>
    %cst_18 = arith.constant 0.000000e+00 : f32
    %38 = vector.broadcast %cst_18 : f32 to vector<4x64x128xf32>
    %39 = arith.maximumf %23, %38 : vector<4x64x128xf32>
    %40 = vector.broadcast %37 : vector<4x1x128xf32> to vector<4x64x128xf32>
    %41 = arith.mulf %39, %40 : vector<4x64x128xf32>
    %42 = vector.shape_cast %41 : vector<4x64x128xf32> to vector<256x128xf32>
    %43 = arith.truncf %42 : vector<256x128xf32> to vector<256x128xbf16>
    %c0_19 = arith.constant 0 : index
    %c0_20 = arith.constant 0 : index
    %44 = vector.load %arg7[%c0_19, %c0_20] : memref<128x128xf32, #tpu.memory_space<vmem>>, vector<128x128xf32>
    %45 = arith.truncf %44 : vector<128x128xf32> to vector<128x128xbf16>
    %cst_21 = arith.constant dense<0.000000e+00> : vector<256x128xf32>
    %46 = tpu.matmul %43, %45, %cst_21 {dimension_numbers = #tpu.dot_dimension_numbers<[1], [0], [0], [1], [0, 0, 1, 1], [], []>} : vector<256x128xbf16>, vector<128x128xbf16>, vector<256x128xf32> -> vector<256x128xf32>
    %c0_22 = arith.constant 0 : index
    %c0_23 = arith.constant 0 : index
    %47 = vector.load %arg8[%c0_22, %c0_23] : memref<1x128xf32, #tpu.memory_space<vmem>>, vector<1x128xf32>
    %48 = vector.broadcast %47 : vector<1x128xf32> to vector<256x128xf32>
    %49 = arith.addf %46, %48 : vector<256x128xf32>
    %50 = vector.shape_cast %49 : vector<256x128xf32> to vector<4x64x128xf32>
    %c0_24 = arith.constant 0 : index
    %c0_25 = arith.constant 0 : index
    %c0_26 = arith.constant 0 : index
    %c0_27 = arith.constant 0 : index
    %51 = vector.load %arg9[%c0_24, %c0_25, %c0_26, %c0_27] : memref<1x4x64x128xf32, #tpu.memory_space<vmem>>, vector<1x4x64x128xf32>
    %52 = vector.shape_cast %51 : vector<1x4x64x128xf32> to vector<4x64x128xf32>
    %53 = vector.shape_cast %50 : vector<4x64x128xf32> to vector<1x4x64x128xf32>
    tpu.vector_store %arg9[%c0_24, %c0_25, %c0_26, %c0_27], %53 {strides = array<i32>} : memref<1x4x64x128xf32, #tpu.memory_space<vmem>>, vector<1x4x64x128xf32>,
    return
  }
  func.func @transform_0(%arg0: i32) -> (i32, i32, i32, i32) {
    %c0_i32 = arith.constant 0 : i32
    %c0_i32_0 = arith.constant 0 : i32
    %c0_i32_1 = arith.constant 0 : i32
    %c0_i32_2 = arith.constant 0 : i32
    return %arg0, %c0_i32, %c0_i32_0, %c0_i32_1 : i32, i32, i32, i32
  }
  func.func @transform_1(%arg0: i32) -> (i32, i32) {
    %c0_i32 = arith.constant 0 : i32
    %c0_i32_0 = arith.constant 0 : i32
    %c0_i32_1 = arith.constant 0 : i32
    return %c0_i32, %c0_i32_0 : i32, i32
  }
  func.func @transform_2(%arg0: i32) -> (i32, i32) {
    %c0_i32 = arith.constant 0 : i32
    %c0_i32_0 = arith.constant 0 : i32
    %c0_i32_1 = arith.constant 0 : i32
    return %c0_i32, %c0_i32_0 : i32, i32
  }
  func.func @transform_3(%arg0: i32) -> (i32, i32) {
    %c0_i32 = arith.constant 0 : i32
    %c0_i32_0 = arith.constant 0 : i32
    %c0_i32_1 = arith.constant 0 : i32
    return %c0_i32, %c0_i32_0 : i32, i32
  }
  func.func @transform_4(%arg0: i32) -> (i32, i32) {
    %c0_i32 = arith.constant 0 : i32
    %c0_i32_0 = arith.constant 0 : i32
    %c0_i32_1 = arith.constant 0 : i32
    return %c0_i32, %c0_i32_0 : i32, i32
  }
  func.func @transform_5(%arg0: i32) -> (i32, i32) {
    %c0_i32 = arith.constant 0 : i32
    %c0_i32_0 = arith.constant 0 : i32
    %c0_i32_1 = arith.constant 0 : i32
    return %c0_i32, %c0_i32_0 : i32, i32
  }
  func.func @transform_6(%arg0: i32) -> (i32, i32) {
    %c0_i32 = arith.constant 0 : i32
    %c0_i32_0 = arith.constant 0 : i32
    %c0_i32_1 = arith.constant 0 : i32
    return %c0_i32, %c0_i32_0 : i32, i32
  }
  func.func @transform_7(%arg0: i32) -> (i32, i32) {
    %c0_i32 = arith.constant 0 : i32
    %c0_i32_0 = arith.constant 0 : i32
    %c0_i32_1 = arith.constant 0 : i32
    return %c0_i32, %c0_i32_0 : i32, i32
  }
  func.func @transform_8(%arg0: i32) -> (i32, i32, i32, i32) {
    %c0_i32 = arith.constant 0 : i32
    %c0_i32_0 = arith.constant 0 : i32
    %c0_i32_1 = arith.constant 0 : i32
    %c0_i32_2 = arith.constant 0 : i32
    return %arg0, %c0_i32, %c0_i32_0, %c0_i32_1 : i32, i32, i32, i32
  }
}

</mosaic_0001>

<bundles_post_ra>
// kernel: tpu_custom_call.1
= control target key start
LH: loop header
LB: loop body
LE: loop exit
PB: predicated region body
PF: predicated region fallthrough
CT: control target
= control target key end

     0   :  { %s3127_s0 = inlined_call_operand.hbm [shape: f32[2,4,64,128], index: 0, kind: input, shape index: {}]   ;;  %s3128_s1 = inlined_call_operand.vmem [shape: f32[1,128], index: 1, kind: input, shape index: {}]   ;;  %s3129_s2 = inlined_call_operand.hbm [shape: f32[128,128], index: 2, kind: input, shape index: {}]   ;;  %s3130_s3 = inlined_call_operand.vmem [shape: f32[1,128], index: 3, kind: input, shape index: {}]   ;;  %s3131_s4 = inlined_call_operand.hbm [shape: f32[128,128], index: 4, kind: input, shape index: {}]   ;;  %s3132_s5 = inlined_call_operand.vmem [shape: f32[1,128], index: 5, kind: input, shape index: {}]   ;;  %s3133_s6 = inlined_call_operand.hbm [shape: f32[128,128], index: 6, kind: input, shape index: {}]   ;;  %s3134_s7 = inlined_call_operand.vmem [shape: f32[1,128], index: 7, kind: input, shape index: {}]   ;;  %s3135_s8 = inlined_call_operand.hbm [shape: f32[2,4,64,128], index: 8, kind: output, shape index: {}]  }
   0x1   :  { %3142 = sst [smem:[#allocation15_spill]] %s3129_s2 }
   0x2   :  { %3143 = sst [smem:[#allocation16_spill]] %s3131_s4 }
   0x3   :  { %13 = vsyncpa [#allocation3], 0 }
   0x4   :  { %15 = vsyncpa [#allocation3 + $0x1], 0 }
   0x5   :  { %16 = vsyncpa [#allocation6], 0 }
   0x6   :  { %17 = vsyncpa [#allocation9], 0 }
   0x7   :  { %18 = vsyncpa [#allocation4], 0 }
   0x8   :  { %20 = vsyncpa [#allocation4 + $0x1], 0  ;;  %s2261_s27 = smov 0   ;;  %s2263_s28 = smov 0  }
   0x9   :  { %s2265_s29 = smov 0   ;;  %s2267_s30 = smov 0  }
   0xa LB: > { %s2282_s9 = sadd.s32 4294967295, %s2205_s30   ;;  %s1616_s10 = sadd.s32 4294967294, %s2205_s30   ;;  %s2205_s30 = sphi %s2267_s30, %s3166_s30   ;;  %s2201_s29 = sphi %s2265_s29, %s3165_s29   ;;  %s2197_s28 = sphi %s2263_s28, %s3164_s28   ;;  %s2193_s27 = sphi %s2261_s27, %s3163_s27  }
   0xb   : > { %p46_p0 = scmp.ne.s32.totalorder %s2197_s28, %s2193_s27  ;;  %p3136_p1 = scmp.eq.s32.totalorder %s2282_s9, 0 }
   0xc   : > { %p217_p2 = scmp.eq.s32.totalorder %s2282_s9, 1  ;;  %p223_p3 = scmp.eq.s32.totalorder %s1616_s10, 1 }
   0xd   : > { %p2291_p4 = por %p3136_p1, %p46_p0  ;;  %p1617_p5 = scmp.ge.s32.totalorder %s2205_s30, 1 }
   0xe   : > { %p2296_p6 = por %p223_p3, %p46_p0  ;;  %p230_p7 = scmp.lt.s32.totalorder %s2205_s30, 3 }
   0xf   : > { %s3144_s11 = scalar_select %p2291_p4, 1, 0 }
  0x10   : > { %s3145_s12 = scalar_select %p2296_p6, 1, 0 }
  0x11   : > { %p2301_p8 = pnand %p1617_p5, %p230_p7  ;;  %s2207_s14 = smov [#allocation5]  }
  0x12   : > { %s245_s15 = sshll.u32 %s2207_s14, 4  ;;  %s2208_s17 = smov [#allocation7]   ;;  %s246_s15 = int_to_ptr.vmem [resolvable:$true] %s245_s15 }
  0x13   : > { %s3146_s13 = scalar_select %p2301_p8, 1, 0 }
  0x14   : > { %p1890_p9 = pneg %p2301_p8  ;;  %s261_s18 = sshll.u32 %s2208_s17, 4  ;;  %s262_s18 = int_to_ptr.vmem [resolvable:$true] %s261_s18 }
  0x15   : > { %s2209_s19 = smov [#allocation8]   ;;  %s2038_s21 = scalar_lea.vmem %s246_s15, 2048 }
  0x16   : > { %p2310_p11 = pnand %p1890_p9, %p3136_p1  ;;  %s277_s20 = sshll.u32 %s2209_s19, 4  ;;  %s278_s20 = int_to_ptr.vmem [resolvable:$true] %s277_s20 }
  0x17   : > { %p2039_p13 = scmp.ne.s32.totalorder %s246_s15, %s2038_s21  ;;  %p2046_p5 = scmp.lt.s32.totalorder %s246_s15, %s246_s15 }
  0x18   : > { %p2029_p12 = pneg %p2310_p11  ;;  %p2047_p7 = scmp.lt.s32.totalorder %s2038_s21, %s2038_s21 }
  0x1a   : > { %p2041_p0 = pnand %p2039_p13, %p2029_p12  ;;  %p2048_p9 = por %p2047_p7, %p2046_p5 }
  0x1c   : > { %p2042_p3 = pneg %p2041_p0 }
  0x1e   : > { %p2049_p10 = pnand %p2048_p9, %p2042_p3 }
  0x20   : > { %2052 = shalt.err (!%p2049_p10)
}
  0x21   : > { %s3137_s22 = smov 128   ;;  %s3138_s23 = smov 8  }
  0x22   : > { %s3148_s2 = sld [smem:[#allocation15_spill]]  ;;  %s2064_s26 = scalar_lea.vmem %s262_s18, 2048 }
  0x23   : > { %p2065_p13 = scmp.ne.s32.totalorder %s262_s18, %s2064_s26  ;;  %p2072_p3 = scmp.lt.s32.totalorder %s262_s18, %s262_s18 }
  0x24   : > { %p2073_p10 = scmp.lt.s32.totalorder %s2064_s26, %s2064_s26 }
  0x25   : > { %p2067_p0 = pnand %p2065_p13, %p2029_p12 }
  0x26   : > { %p2074_p7 = por %p2073_p10, %p2072_p3 }
  0x27   : > { %p2068_p5 = pneg %p2067_p0 }
  0x28   : > { %1893 = dma.hbm_to_vmem [thread:$0]  (!%p2310_p11), %s3148_s2, 2048, %s246_s15, [#allocation6], %s3137_s22, %s3137_s22, %s3138_s23  }
  0x29   : > { %p2075_p9 = pnand %p2074_p7, %p2068_p5 }
  0x2b   : > { %2078 = shalt.err (!%p2075_p9)
}
  0x2c   : > { %s3149_s4 = sld [smem:[#allocation16_spill]]  ;;  %s2090_s15 = scalar_lea.vmem %s278_s20, 2048 }
  0x2d   : > { %p2091_p1 = scmp.ne.s32.totalorder %s278_s20, %s2090_s15  ;;  %p2098_p3 = scmp.lt.s32.totalorder %s278_s20, %s278_s20 }
  0x2e   : > { %p2099_p5 = scmp.lt.s32.totalorder %s2090_s15, %s2090_s15 }
  0x2f   : > { %p2093_p13 = pnand %p2091_p1, %p2029_p12 }
  0x30   : > { %p2100_p10 = por %p2099_p5, %p2098_p3 }
  0x31   : > { %p2094_p0 = pneg %p2093_p13 }
  0x32   : > { %1896 = dma.hbm_to_vmem [thread:$0]  (!%p2310_p11), %s3149_s4, 2048, %s262_s18, [#allocation6], %s3137_s22, %s3137_s22, %s3138_s23  }
  0x33   : > { %p2101_p7 = pnand %p2100_p10, %p2094_p0 }
  0x35   : > { %2104 = shalt.err (!%p2101_p7)
}
  0x36   : > { %1899 = dma.hbm_to_vmem [thread:$0]  (!%p2310_p11), %s3133_s6, 2048, %s278_s20, [#allocation9], %s3137_s22, %s3137_s22, %s3138_s23  }
  0x37   : > { %s2350_s18 = sadd.s32 1, %s2205_s30   ;;  %s33_s21 = sadd.s32 1, %s2201_s29 }
  0x38   : > { %s30_s16 = ssub.s32 %s2205_s30, %s2350_s18  ;;  %p40_p12 = scmp.ne.s32.totalorder %s2201_s29, %s2197_s28 }
  0x39   : > { %p31_p1 = scmp.eq.s32.totalorder %s30_s16, 0  ;;  %p41_p9 = scmp.eq.s32.totalorder %s2205_s30, 0 }
  0x3a   : > { %p1911_p13 = scmp.lt.s32.totalorder %s2205_s30, 2  ;;  %p2364_p3 = por %p217_p2, %p40_p12 }
  0x3b   : > { %s2360_s24 = scalar_select %p31_p1, %s2201_s29, %s33_s21  }
  0x3c   : > { %p42_p0 = por %p41_p9, %p40_p12  ;;  %s294_s26 = sand.u32 1, %s2201_s29  }
  0x3d   : > { %s3150_s25 = scalar_select %p2364_p3, 1, 0 }
  0x3e   : > { %s1640_s10 = sshll.u32 %s2205_s30, 12  ;;  %s1622_s20 = sshll.u32 %s294_s26, 8 }
  0x3f   : > { %s2373_s17 = scalar_lea.hbm %s3127_s0, %s1640_s10  ;;  %s298_s19 = scalar_lea.vmem [#allocation2], %s1622_s20 }
  0x40   : > { %s305_s16 = sshll.u32 %s298_s19, 4  ;;  %p2375_p11 = pnand %p1911_p13, %p42_p0  ;;  %s2379_s16 = int_to_ptr.vmem [resolvable:$true] %s305_s16 }
  0x41   : > { %s2381_s22 = scalar_lea.sflag [#allocation3], %s294_s26  ;;  %s2105_s23 = scalar_lea.hbm %s2373_s17, 4096 }
  0x42   : > { %p2106_p2 = scmp.ne.s32.totalorder %s2373_s17, %s2105_s23  ;;  %p2107_p5 = pneg %p2375_p11 }
  0x43   : > { %s2110_s20 = scalar_lea.hbm %s3127_s0, 8192  ;;  %p2111_p1 = scmp.lt.s32.totalorder %s2373_s17, %s3127_s0 }
  0x44   : > { %p2108_p10 = pnand %p2107_p5, %p2106_p2  ;;  %p2112_p12 = scmp.lt.s32.totalorder %s2110_s20, %s2105_s23 }
  0x46   : > { %p2109_p7 = pneg %p2108_p10  ;;  %p2113_p9 = por %p2112_p12, %p2111_p1 }
  0x48   : > { %p2114_p13 = pnand %p2113_p9, %p2109_p7 }
  0x4a   : > { %2117 = shalt.err (!%p2114_p13)
}
  0x4b   : > { %s2118_s26 = scalar_lea.vmem %s2379_s16, 4096  ;;  %s2212_s2 = smov [#allocation2]  }
  0x4c   : > { %p2119_p0 = scmp.ne.s32.totalorder %s2379_s16, %s2118_s26  ;;  %s2123_s4 = sshll.u32 %s2212_s2, 4  ;;  %s2124_s4 = int_to_ptr.vmem [resolvable:$false] %s2123_s4 }
  0x4d   : > { %s2125_s10 = scalar_lea.vmem %s2124_s4, 8192  ;;  %p2126_p10 = scmp.lt.s32.totalorder %s2379_s16, %s2124_s4 }
  0x4e   : > { %p2121_p6 = pnand %p2119_p0, %p2107_p5  ;;  %p2127_p3 = scmp.lt.s32.totalorder %s2125_s10, %s2118_s26 }
  0x50   : > { %p2122_p2 = pneg %p2121_p6  ;;  %p2128_p4 = por %p2127_p3, %p2126_p10 }
  0x52   : > { %p2129_p8 = pnand %p2128_p4, %p2122_p2 }
  0x54   : > { %2132 = shalt.err (!%p2129_p8)
}
  0x55   : > { %s3152_s23 = smov 8   ;;  %s3153_s14 = smov 128  }
  0x56   : > { %1903 = dma.hbm_to_vmem [thread:$0]  (!%p2375_p11), %s2373_s17, 4096, %s2379_s16, %s2381_s22, %s3153_s14, %s3153_s14, %s3152_s23  }
  0x57   : > { %p3154_p6 = scmp.ne.s32.totalorder %s3146_s13, 0 }
  0x58   : > { %s2408_s2 = sand.u32 (!%p3154_p6), 1, %s2197_s28   ;;  %p3155_p4 = scmp.ne.s32.totalorder (!%p3154_p6), %s3144_s11, 0 }
  0x59   : > { %317 = sbr.rel (%p3154_p6) target bundleno = 648 (0x288), region = 52  ;;  %s1626_s4 = sshll.u32 (!%p3154_p6), %s2408_s2, 8 }
  0x5a   : > { %s320_s20 = scalar_lea.sflag (!%p3154_p6), [#allocation3], %s2408_s2  ;;  %s2414_s21 = scalar_lea.vmem (!%p3154_p6), [#allocation2], %s1626_s4 }
  0x5e   : > { %2176 = dma.done.wait (%p3155_p4), %s320_s20, 4096  }
  0x5f   : > { %2178 = vsyncadd (%p3155_p4), %s320_s20, 4294963200  ;;  %p3156_p8 = scmp.eq.s32.totalorder %s2282_s9, 0 }
  0x61   : > { %2180 = dma.done.wait (%p3156_p8), [#allocation6], 4096   ;;  %p3157_p3 = pmov %p3156_p8 }
  0x63   : > { %2182 = vsyncadd (%p3157_p3), [#allocation6], 4294963200  ;;  %p3158_p11 = pmov %p3157_p3 }
  0x64   : > { %p3159_p5 = pmov %p3157_p3 }
  0x65   : > { %2184 = dma.done.wait (%p3158_p11), [#allocation9], 2048  }
  0x66   : > { %2186 = vsyncadd (%p3159_p5), [#allocation9], 4294965248  ;;  %v534_v0 = vld [vmem:[#allocation5 + $0x70] sm:$0xff]  ;;  %v535_v1 = vld [vmem:[#allocation5 + $0x78] sm:$0xff]  ;;  %s3012_s10 = scalar_lea.vmem [#allocation10], %s1626_s4  ;;  %s1641_s23 = sshll.u32 %s2282_s9, 12 }
  0x67   : > { %v532_v2 = vld [vmem:[#allocation5 + $0x60] sm:$0xff]  ;;  %v543_v3 = vpack.c.bf16 %v535_v1, %v534_v0  ;;  %v533_v4 = vld [vmem:[#allocation5 + $0x68] sm:$0xff]  ;;  %v2436_v9 = vld [vmem:[%s2414_s21 + $0x10] sm:$0xff]  ;;  %s1514_s14 = sshll.u32 %s3012_s10, 4  ;;  %s1501_s9 = scalar_lea.sflag [#allocation4], %s2408_s2  ;;  %s3081_s14 = int_to_ptr.vmem [resolvable:$true] %s1514_s14 }
  0x68   : > { %v369_v5 = vld [vmem:[%s2414_s21] sm:$0xff]  ;;  %v542_v7 = vpack.c.bf16 %v533_v4, %v532_v2  ;;  %v530_v10 = vld [vmem:[#allocation5 + $0x50] sm:$0xff]  ;;  %v2439_v11 = vld [vmem:[%s2414_s21 + $0x18] sm:$0xff]  ;;  %s2133_s11 = scalar_lea.vmem %s3081_s14, 4096  ;;  %p3160_p1 = scmp.ne.s32.totalorder %s3150_s25, 0 }
  0x69   : > { %v2432_v6 = vld [vmem:[%s3128_s1] ss:$0 sm:$0xff]  ;;  %1714 = vmatprep.subr.bf16.mxu0 %v543_v3  ;;  %1858 = vmatprep.subr.bf16.mxu1 %v543_v3  ;;  %v531_v13 = vld [vmem:[#allocation5 + $0x58] sm:$0xff]  ;;  %v370_v14 = vld [vmem:[%s2414_s21 + $0x8] sm:$0xff]  ;;  %p2134_p7 = scmp.ne.s32.totalorder %s3081_s14, %s2133_s11  ;;  %s2213_s13 = smov [#allocation10]  }
  0x6a   : > { %v424_v8 = vmul.f32 %v2432_v6, %v369_v5  ;;  %v426_v12 = vmul.f32 %v2432_v6, %v2436_v9  ;;  %1715 = vmatpush3.bf16.msra.mxu0 %v543_v3  ;;  %1866 = vmatpush3.bf16.msra.mxu1 %v543_v3  ;;  %v2444_v15 = vpack.c.bf16 %v370_v14, %v369_v5  ;;  %v528_v19 = vld [vmem:[#allocation5 + $0x40] sm:$0xff]  ;;  %v529_v20 = vld [vmem:[#allocation5 + $0x48] sm:$0xff]  ;;  %v526_v24 = vld [vmem:[#allocation5 + $0x30] sm:$0xff]  ;;  %s2137_s22 = sshll.u32 %s2213_s13, 4  ;;  %s2138_s22 = int_to_ptr.vmem [resolvable:$false] %s2137_s22 }
  0x6b   : > { %1716 = vmatprep.subr.bf16.mxu0 %v542_v7  ;;  %1859 = vmatprep.subr.bf16.mxu1 %v542_v7  ;;  %v541_v16 = vpack.c.bf16 %v531_v13, %v530_v10  ;;  %v425_v17 = vmul.f32 %v2432_v6, %v370_v14  ;;  %v427_v18 = vmul.f32 %v2432_v6, %v2439_v11  ;;  %v2450_v21 = vld [vmem:[%s2414_s21 + $0x20] sm:$0xff]  ;;  %v2453_v22 = vld [vmem:[%s2414_s21 + $0x28] sm:$0xff]  ;;  %v527_v27 = vld [vmem:[#allocation5 + $0x38] sm:$0xff]  ;;  %p2135_p12 = pnand %p2134_p7, %p3160_p1  ;;  %s2139_s17 = scalar_lea.vmem %s2138_s22, 8192 }
  0x6c   : > { %456 = vadd.xlane.f32.xlu0 %v424_v8  ;;  %460 = vadd.xlane.f32.xlu1 %v426_v12  ;;  %v540_v23 = vpack.c.bf16 %v529_v20, %v528_v19  ;;  %v428_v25 = vmul.f32 %v2432_v6, %v2450_v21  ;;  %v429_v26 = vmul.f32 %v2432_v6, %v2453_v22  ;;  %v2461_v28 = vld [vmem:[%s2414_s21 + $0x80] sm:$0xff]  ;;  %v2464_v29 = vld [vmem:[%s2414_s21 + $0x88] sm:$0xff]  ;;  %v2467_v30 = vld [vmem:[%s2414_s21 + $0x30] sm:$0xff]  ;;  %p2140_p13 = scmp.lt.s32.totalorder %s3081_s14, %s2138_s22  ;;  %p2141_p0 = scmp.lt.s32.totalorder %s2139_s17, %s2133_s11 }
  0x6d   : > { %1730 = vmatprep.mubr.bf16.mxu0 %v2444_v15  ;;  %v2470_v31 = vld [vmem:[%s2414_s21 + $0x38] sm:$0xff]  ;;  %v2474_v32 = vpack.c.bf16 %v2464_v29, %v2461_v28  ;;  %v539_v33 = vpack.c.bf16 %v527_v27, %v526_v24  ;;  %v430_v34 = vmul.f32 %v2432_v6, %v2467_v30  ;;  %v524_v36 = vld [vmem:[#allocation5 + $0x20] sm:$0xff]  ;;  %v525_v37 = vld [vmem:[#allocation5 + $0x28] sm:$0xff]  ;;  %v2535_v12 = vpack.c.bf16 %v2453_v22, %v2450_v21  ;;  %p2136_p9 = pneg %p2135_p12 }
  0x6e   : > { %1717 = vmatpush3.bf16.msra.mxu0 %v542_v7  ;;  %1867 = vmatpush3.bf16.msra.mxu1 %v542_v7  ;;  %v431_v35 = vmul.f32 %v2432_v6, %v2470_v31  ;;  %v2481_v38 = vld [vmem:[%s2414_s21 + $0x40] sm:$0xff]  ;;  %v2484_v39 = vld [vmem:[%s2414_s21 + $0x48] sm:$0xff]  ;;  %v538_v40 = vpack.c.bf16 %v525_v37, %v524_v36  ;;  %v522_v43 = vld [vmem:[#allocation5 + $0x10] sm:$0xff]  ;;  %v2527_v7 = vpack.c.bf16 %v2439_v11, %v2436_v9  ;;  %p2142_p2 = por %p2141_p0, %p2140_p13 }
  0x6f   : > { %1718 = vmatprep.subr.bf16.mxu0 %v541_v16  ;;  %1860 = vmatprep.subr.bf16.mxu1 %v541_v16  ;;  %v432_v41 = vmul.f32 %v2432_v6, %v2481_v38  ;;  %v433_v42 = vmul.f32 %v2432_v6, %v2484_v39  ;;  %v523_v44 = vld [vmem:[#allocation5 + $0x18] sm:$0xff]  ;;  %v2492_v45 = vld [vmem:[%s2414_s21 + $0x50] sm:$0xff]  ;;  %v520_v50 = vld [vmem:[#allocation5] sm:$0xff]  ;;  %v440_v9 = vmul.f32 %v2432_v6, %v2461_v28 }
  0x70   : > { %458 = vadd.xlane.f32.xlu0 %v425_v17  ;;  %462 = vadd.xlane.f32.xlu1 %v427_v18  ;;  %v2495_v46 = vld [vmem:[%s2414_s21 + $0x58] sm:$0xff]  ;;  %v537_v47 = vpack.c.bf16 %v523_v44, %v522_v43  ;;  %v434_v48 = vmul.f32 %v2432_v6, %v2492_v45  ;;  %v521_v51 = vld [vmem:[#allocation5 + $0x8] sm:$0xff]  ;;  %v2502_v52 = vld [vmem:[%s2414_s21 + $0x60] sm:$0xff]  ;;  %v441_v11 = vmul.f32 %v2432_v6, %v2464_v29  ;;  %p2143_p10 = pnand %p2142_p2, %p2136_p9 }
  0x71   : > { %1746 = vmatprep.mubr.bf16.mxu1 %v2474_v32  ;;  %v435_v49 = vmul.f32 %v2432_v6, %v2495_v46  ;;  %v2505_v53 = vld [vmem:[%s2414_s21 + $0x68] sm:$0xff]  ;;  %v536_v54 = vpack.c.bf16 %v521_v51, %v520_v50  ;;  %v436_v55 = vmul.f32 %v2432_v6, %v2502_v52  ;;  %v726_v57 = vld [vmem:[#allocation7 + $0x70] sm:$0xff]  ;;  %v727_v58 = vld [vmem:[#allocation7 + $0x78] sm:$0xff]  ;;  %v2561_v29 = vpack.c.bf16 %v2484_v39, %v2481_v38 }
  0x72   : > { %1719 = vmatpush3.bf16.msra.mxu0 %v541_v16  ;;  %1868 = vmatpush3.bf16.msra.mxu1 %v541_v16  ;;  %v437_v56 = vmul.f32 %v2432_v6, %v2505_v53  ;;  %v2512_v59 = vld [vmem:[%s2414_s21 + $0x70] sm:$0xff]  ;;  %v2515_v60 = vld [vmem:[%s2414_s21 + $0x78] sm:$0xff]  ;;  %v735_v63 = vpack.c.bf16 %v727_v58, %v726_v57  ;;  %v389_v0 = vld [vmem:[%s2414_s21 + $0xa0] sm:$0xff]  ;;  %v407_v50 = vpack.c.bf16 %v2505_v53, %v2502_v52 }
  0x73   : > { %1720 = vmatprep.subr.bf16.mxu0 %v540_v23  ;;  %1861 = vmatprep.subr.bf16.mxu1 %v540_v23  ;;  %v387_v61 = vld [vmem:[%s2414_s21 + $0x90] sm:$0xff]  ;;  %v388_v62 = vld [vmem:[%s2414_s21 + $0x98] sm:$0xff]  ;;  %v390_v1 = vld [vmem:[%s2414_s21 + $0xa8] sm:$0xff]  ;;  %v438_v2 = vmul.f32 %v2432_v6, %v2512_v59  ;;  %v439_v3 = vmul.f32 %v2432_v6, %v2515_v60 }
  0x74   : > { %464 = vadd.xlane.f32.xlu0 %v428_v25  ;;  %466 = vadd.xlane.f32.xlu1 %v429_v26  ;;  %v724_v4 = vld [vmem:[#allocation7 + $0x60] sm:$0xff]  ;;  %v725_v5 = vld [vmem:[#allocation7 + $0x68] sm:$0xff]  ;;  %v2529_v8 = vpack.c.bf16 %v388_v62, %v387_v61  ;;  %v2531_v10 = vpack.c.bf16 %v390_v1, %v389_v0  ;;  %v722_v14 = vld [vmem:[#allocation7 + $0x50] sm:$0xff]  ;;  %v442_v22 = vmul.f32 %v2432_v6, %v387_v61 }
  0x75   : > { %v734_v13 = vpack.c.bf16 %v725_v5, %v724_v4  ;;  %v723_v16 = vld [vmem:[#allocation7 + $0x58] sm:$0xff]  ;;  %v391_v17 = vld [vmem:[%s2414_s21 + $0xb0] sm:$0xff]  ;;  %v393_v20 = vld [vmem:[%s2414_s21 + $0xc0] sm:$0xff]  ;;  %v2553_v26 = vpack.c.bf16 %v2470_v31, %v2467_v30  ;;  %v444_v30 = vmul.f32 %v2432_v6, %v389_v0  ;;  %v445_v31 = vmul.f32 %v2432_v6, %v390_v1 }
  0x76   : > { %1721 = vmatpush3.bf16.msra.mxu0 %v540_v23  ;;  %1869 = vmatpush3.bf16.msra.mxu1 %v540_v23  ;;  %v392_v18 = vld [vmem:[%s2414_s21 + $0xb8] sm:$0xff]  ;;  %v733_v19 = vpack.c.bf16 %v723_v16, %v722_v14  ;;  %v394_v21 = vld [vmem:[%s2414_s21 + $0xc8] sm:$0xff]  ;;  %v443_v23 = vmul.f32 %v2432_v6, %v388_v62  ;;  %v720_v24 = vld [vmem:[#allocation7 + $0x40] sm:$0xff] }
  0x77   : > { %1722 = vmatprep.subr.bf16.mxu0 %v539_v33  ;;  %1862 = vmatprep.subr.bf16.mxu1 %v539_v33  ;;  %v721_v25 = vld [vmem:[#allocation7 + $0x48] sm:$0xff]  ;;  %v2555_v27 = vpack.c.bf16 %v392_v18, %v391_v17  ;;  %v2557_v28 = vpack.c.bf16 %v394_v21, %v393_v20  ;;  %v395_v36 = vld [vmem:[%s2414_s21 + $0xd0] sm:$0xff]  ;;  %v396_v37 = vld [vmem:[%s2414_s21 + $0xd8] sm:$0xff] }
  0x78   : > { %468 = vadd.xlane.f32.xlu0 %v430_v34  ;;  %470 = vadd.xlane.f32.xlu1 %v431_v35  ;;  %v718_v34 = vld [vmem:[#allocation7 + $0x30] sm:$0xff]  ;;  %v719_v35 = vld [vmem:[#allocation7 + $0x38] sm:$0xff]  ;;  %v397_v39 = vld [vmem:[%s2414_s21 + $0xe0] sm:$0xff]  ;;  %v450_v52 = vmul.f32 %v2432_v6, %v395_v36  ;;  %v451_v53 = vmul.f32 %v2432_v6, %v396_v37 }
  0x79   : > { %v731_v38 = vpack.c.bf16 %v719_v35, %v718_v34  ;;  %v716_v43 = vld [vmem:[#allocation7 + $0x20] sm:$0xff]  ;;  %v717_v44 = vld [vmem:[#allocation7 + $0x28] sm:$0xff]  ;;  %v715_v57 = vld [vmem:[#allocation7 + $0x18] sm:$0xff] }
  0x7a   : > { %1723 = vmatpush3.bf16.msra.mxu0 %v539_v33  ;;  %1870 = vmatpush3.bf16.msra.mxu1 %v539_v33  ;;  %v732_v33 = vpack.c.bf16 %v721_v25, %v720_v24  ;;  %v730_v51 = vpack.c.bf16 %v717_v44, %v716_v43  ;;  %v712_v61 = vld [vmem:[#allocation7] sm:$0xff]  ;;  %v713_v62 = vld [vmem:[#allocation7 + $0x8] sm:$0xff]  ;;  %v1282_v24 = vld [vmem:[#allocation8 + $0x30] sm:$0xff] }
  0x7b   : > { %1724 = vmatprep.subr.bf16.mxu0 %v538_v40  ;;  %1863 = vmatprep.subr.bf16.mxu1 %v538_v40  ;;  %v728_v1 = vpack.c.bf16 %v713_v62, %v712_v61  ;;  %v1288_v5 = vld [vmem:[#allocation8 + $0x60] sm:$0xff]  ;;  %v1283_v25 = vld [vmem:[#allocation8 + $0x38] sm:$0xff]  ;;  %v1278_v34 = vld [vmem:[#allocation8 + $0x10] sm:$0xff] }
  0x7c   : > { %472 = vadd.xlane.f32.xlu0 %v432_v41  ;;  %474 = vadd.xlane.f32.xlu1 %v433_v42  ;;  %v446_v41 = vmul.f32 %v2432_v6, %v391_v17  ;;  %v447_v42 = vmul.f32 %v2432_v6, %v392_v18 }
  0x7e   : > { %1725 = vmatpush3.bf16.msra.mxu0 %v538_v40  ;;  %1871 = vmatpush3.bf16.msra.mxu1 %v538_v40  ;;  %v398_v40 = vld [vmem:[%s2414_s21 + $0xe8] sm:$0xff] }
  0x7f   : > { %1726 = vmatprep.subr.bf16.mxu0 %v537_v47  ;;  %1864 = vmatprep.subr.bf16.mxu1 %v537_v47 }
  0x80   : > { %476 = vadd.xlane.f32.xlu0 %v434_v48  ;;  %478 = vadd.xlane.f32.xlu1 %v435_v49  ;;  %v414_v48 = vpack.c.bf16 %v396_v37, %v395_v36  ;;  %v415_v49 = vpack.c.bf16 %v398_v40, %v397_v39  ;;  %v1279_v36 = vld [vmem:[#allocation8 + $0x18] sm:$0xff] }
  0x82   : > { %1727 = vmatpush3.bf16.msra.mxu0 %v537_v47  ;;  %1872 = vmatpush3.bf16.msra.mxu1 %v537_v47  ;;  %v406_v47 = vpack.c.bf16 %v2495_v46, %v2492_v45  ;;  %v399_v45 = vld [vmem:[%s2414_s21 + $0xf0] sm:$0xff]  ;;  %v400_v46 = vld [vmem:[%s2414_s21 + $0xf8] sm:$0xff]  ;;  %s3079_s21 = scalar_lea.hbm %s3135_s8, %s1641_s23 }
  0x83   : > { %1728 = vmatprep.subr.bf16.mxu0 %v536_v54  ;;  %1865 = vmatprep.subr.bf16.mxu1 %v536_v54  ;;  %v416_v0 = vpack.c.bf16 %v400_v46, %v399_v45 }
  0x84   : > { %480 = vadd.xlane.f32.xlu0 %v436_v55  ;;  %482 = vadd.xlane.f32.xlu1 %v437_v56  ;;  %v449_v55 = vmul.f32 %v2432_v6, %v394_v21  ;;  %v714_v56 = vld [vmem:[#allocation7 + $0x10] sm:$0xff] }
  0x85   : > { %v729_v58 = vpack.c.bf16 %v715_v57, %v714_v56 }
  0x86   : > { %1729 = vmatpush3.bf16.msra.mxu0 %v536_v54  ;;  %1873 = vmatpush3.bf16.msra.mxu1 %v536_v54  ;;  %v448_v54 = vmul.f32 %v2432_v6, %v393_v20 }
  0x87   : > { %1762 = vmatprep.subr.bf16.mxu1 %v735_v63 }
  0x88   : > { %484 = vadd.xlane.f32.xlu0 %v438_v2  ;;  %486 = vadd.xlane.f32.xlu1 %v439_v3  ;;  %v452_v2 = vmul.f32 %v2432_v6, %v397_v39  ;;  %v453_v3 = vmul.f32 %v2432_v6, %v398_v40  ;;  %v1276_v39 = vld [vmem:[#allocation8] sm:$0xff]  ;;  %v1277_v40 = vld [vmem:[#allocation8 + $0x8] sm:$0xff] }
  0x89   : > { %1731 = vmatmul.mubr.bf16.vlgmr.msra.gmra.mxu0 %v2527_v7  ;;  %1747 = vmatmul.mubr.bf16.vlgmr.msra.gmra.mxu1 %v2529_v8 }
  0x8a   : > { %1763 = vmatpush3.bf16.msra.mxu1 %v735_v63  ;;  %1750 = vmatprep.mubr.bf16.mxu1 %v2531_v10  ;;  %v408_v63 = vpack.c.bf16 %v2515_v60, %v2512_v59  ;;  %v454_v59 = vmul.f32 %v2432_v6, %v399_v45  ;;  %v455_v60 = vmul.f32 %v2432_v6, %v400_v46  ;;  %v1290_v6 = vld [vmem:[#allocation8 + $0x70] sm:$0xff] }
  0x8b   : > { %1764 = vmatprep.subr.bf16.mxu1 %v734_v13  ;;  %1734 = vmatprep.mubr.bf16.mxu0 %v2535_v12 }
  0x8c   : > { %488 = vadd.xlane.f32.xlu0 %v440_v9  ;;  %490 = vadd.xlane.f32.xlu1 %v441_v11  ;;  %v1285_v9 = vld [vmem:[#allocation8 + $0x48] sm:$0xff] }
  0x8e   : > { %1765 = vmatpush3.bf16.msra.mxu1 %v734_v13  ;;  %v1284_v13 = vld [vmem:[#allocation8 + $0x40] sm:$0xff] }
  0x8f   : > { %1766 = vmatprep.subr.bf16.mxu1 %v733_v19  ;;  %v1296_v11 = vpack.c.bf16 %v1285_v9, %v1284_v13 }
  0x90   : > { %492 = vadd.xlane.f32.xlu0 %v442_v22  ;;  %494 = vadd.xlane.f32.xlu1 %v443_v23 }
  0x91   : > { %1735 = vmatmul.mubr.bf16.gmra.mxu0 %v2553_v26  ;;  %1751 = vmatmul.mubr.bf16.gmra.mxu1 %v2555_v27 }
  0x92   : > { %1767 = vmatpush3.bf16.msra.mxu1 %v733_v19  ;;  %1754 = vmatprep.mubr.bf16.mxu1 %v2557_v28 }
  0x93   : > { %1768 = vmatprep.subr.bf16.mxu1 %v732_v33  ;;  %1738 = vmatprep.mubr.bf16.mxu0 %v2561_v29 }
  0x94   : > { %496 = vadd.xlane.f32.xlu0 %v444_v30  ;;  %498 = vadd.xlane.f32.xlu1 %v445_v31  ;;  %v1280_v30 = vld [vmem:[#allocation8 + $0x20] sm:$0xff]  ;;  %v1281_v31 = vld [vmem:[#allocation8 + $0x28] sm:$0xff] }
  0x95   : > { %v1294_v35 = vpack.c.bf16 %v1281_v31, %v1280_v30 }
  0x96   : > { %1769 = vmatpush3.bf16.msra.mxu1 %v732_v33 }
  0x97   : > { %1770 = vmatprep.subr.bf16.mxu1 %v731_v38 }
  0x98   : > { %500 = vadd.xlane.f32.xlu0 %v446_v41  ;;  %502 = vadd.xlane.f32.xlu1 %v447_v42 }
  0x99   : > { %1739 = vmatmul.mubr.bf16.gmra.mxu0 %v406_v47  ;;  %1755 = vmatmul.mubr.bf16.gmra.mxu1 %v414_v48 }
  0x9a   : > { %1771 = vmatpush3.bf16.msra.mxu1 %v731_v38  ;;  %1758 = vmatprep.mubr.bf16.mxu1 %v415_v49  ;;  %v1293_v38 = vpack.c.bf16 %v1279_v36, %v1278_v34 }
  0x9b   : > { %1772 = vmatprep.subr.bf16.mxu1 %v730_v51  ;;  %1742 = vmatprep.mubr.bf16.mxu0 %v407_v50 }
  0x9c   : > { %504 = vadd.xlane.f32.xlu0 %v448_v54  ;;  %506 = vadd.xlane.f32.xlu1 %v449_v55 }
  0x9e   : > { %1773 = vmatpush3.bf16.msra.mxu1 %v730_v51 }
  0x9f   : > { %1774 = vmatprep.subr.bf16.mxu1 %v729_v58 }
  0xa0   : > { %508 = vadd.xlane.f32.xlu0 %v450_v52  ;;  %510 = vadd.xlane.f32.xlu1 %v451_v53 }
  0xa1   : > { %1743 = vmatmul.mubr.bf16.gmra.mxu0 %v408_v63  ;;  %1759 = vmatmul.mubr.bf16.gmra.mxu1 %v416_v0 }
  0xa2   : > { %1775 = vmatpush3.bf16.msra.mxu1 %v729_v58  ;;  %1778 = vmatprep.mubr.bf16.mxu1 %v2444_v15  ;;  %v1291_v15 = vld [vmem:[#allocation8 + $0x78] sm:$0xff] }
  0xa3   : > { %1776 = vmatprep.subr.bf16.mxu1 %v728_v1  ;;  %v1299_v4 = vpack.c.bf16 %v1291_v15, %v1290_v6 }
  0xa4   : > { %512 = vadd.xlane.f32.xlu0 %v452_v2  ;;  %514 = vadd.xlane.f32.xlu1 %v453_v3 }
  0xa5   : > { %1810 = vmatprep.subr.bf16.mxu0 %v1299_v4 }
  0xa6   : > { %1777 = vmatpush3.bf16.msra.mxu1 %v728_v1  ;;  %1811 = vmatpush3.bf16.msra.mxu0 %v1299_v4 }
  0xa8   : > { %516 = vadd.xlane.f32.xlu0 %v454_v59  ;;  %518 = vadd.xlane.f32.xlu1 %v455_v60 }
  0xa9   : > { %1779 = vmatmul.mubr.bf16.vlgmr.msra.gmra.mxu1 %v2527_v7  ;;  %v1289_v7 = vld [vmem:[#allocation8 + $0x68] sm:$0xff] }
  0xaa   : > { %1782 = vmatprep.mubr.bf16.mxu1 %v2535_v12  ;;  %v1298_v12 = vpack.c.bf16 %v1289_v7, %v1288_v5 }
  0xac   : > { %1812 = vmatprep.subr.bf16.mxu0 %v1298_v12 }
  0xad   : > { %1813 = vmatpush3.bf16.msra.mxu0 %v1298_v12 }
  0xb1   : > { %1783 = vmatmul.mubr.bf16.gmra.mxu1 %v2553_v26  ;;  %v1295_v26 = vpack.c.bf16 %v1283_v25, %v1282_v24 }
  0xb2   : > { %1786 = vmatprep.mubr.bf16.mxu1 %v2561_v29 }
  0xb9   : > { %1787 = vmatmul.mubr.bf16.gmra.mxu1 %v406_v47  ;;  %v1292_v47 = vpack.c.bf16 %v1277_v40, %v1276_v39 }
  0xba   : > { %1790 = vmatprep.mubr.bf16.mxu1 %v407_v50 }
  0xc1   : > { %1791 = vmatmul.mubr.bf16.gmra.mxu1 %v408_v63 }
  0xc2   : > { %1794 = vmatprep.mubr.bf16.mxu1 %v2474_v32  ;;  %v1286_v32 = vld [vmem:[#allocation8 + $0x50] sm:$0xff] }
  0xc9   : > { %1795 = vmatmul.mubr.bf16.gmra.mxu1 %v2529_v8  ;;  %v1287_v8 = vld [vmem:[#allocation8 + $0x58] sm:$0xff] }
  0xca   : > { %1798 = vmatprep.mubr.bf16.mxu1 %v2531_v10  ;;  %v1297_v10 = vpack.c.bf16 %v1287_v8, %v1286_v32 }
  0xcc   : > { %1814 = vmatprep.subr.bf16.mxu0 %v1297_v10 }
  0xcd   : > { %1815 = vmatpush3.bf16.msra.mxu0 %v1297_v10 }
  0xce   : > { %1816 = vmatprep.subr.bf16.mxu0 %v1296_v11 }
  0xd1   : > { %1799 = vmatmul.mubr.bf16.gmra.mxu1 %v2555_v27  ;;  %1817 = vmatpush3.bf16.msra.mxu0 %v1296_v11 }
  0xd2   : > { %1802 = vmatprep.mubr.bf16.mxu1 %v2557_v28  ;;  %1818 = vmatprep.subr.bf16.mxu0 %v1295_v26 }
  0xd5   : > { %1819 = vmatpush3.bf16.msra.mxu0 %v1295_v26 }
  0xd6   : > { %1820 = vmatprep.subr.bf16.mxu0 %v1294_v35 }
  0xd9   : > { %1803 = vmatmul.mubr.bf16.gmra.mxu1 %v414_v48  ;;  %1821 = vmatpush3.bf16.msra.mxu0 %v1294_v35 }
  0xda   : > { %1806 = vmatprep.mubr.bf16.mxu1 %v415_v49  ;;  %1822 = vmatprep.subr.bf16.mxu0 %v1293_v38 }
  0xdd   : > { %1823 = vmatpush3.bf16.msra.mxu0 %v1293_v38 }
  0xde   : > { %1824 = vmatprep.subr.bf16.mxu0 %v1292_v47 }
  0xe1   : > { %1807 = vmatmul.mubr.bf16.gmra.mxu1 %v416_v0  ;;  %1825 = vmatpush3.bf16.msra.mxu0 %v1292_v47 }
  0xf5   : > { %v2601_v14 = vpop.xlane.xlu0 %456  ;;  %v2603_v16 = vpop.xlane.xlu1 %460 }
  0xf9   : > { %v2605_v17 = vpop.xlane.xlu0 %458  ;;  %v2607_v18 = vpop.xlane.xlu1 %462 }
  0xfa   : > { %v904_v19 = vmax.f32 %v2601_v14, %v2605_v17 }
  0xfc   : > { %v905_v20 = vmax.f32 %v904_v19, %v2603_v16 }
  0xfd   : > { %v2612_v21 = vpop.xlane.xlu0 %464  ;;  %v2614_v22 = vpop.xlane.xlu1 %466 }
  0xfe   : > { %v906_v23 = vmax.f32 %v905_v20, %v2607_v18 }
 0x100   : > { %v907_v27 = vmax.f32 %v906_v23, %v2612_v21 }
 0x101   : > { %v2618_v28 = vpop.xlane.xlu0 %468  ;;  %v2620_v29 = vpop.xlane.xlu1 %470 }
 0x102   : > { %v908_v33 = vmax.f32 %v907_v27, %v2614_v22 }
 0x104   : > { %v909_v37 = vmax.f32 %v908_v33, %v2618_v28 }
 0x105   : > { %v2624_v41 = vpop.xlane.xlu0 %472  ;;  %v2626_v42 = vpop.xlane.xlu1 %474 }
 0x106   : > { %v910_v43 = vmax.f32 %v909_v37, %v2620_v29  ;;  %v917_v44 = vmax.f32 %v2624_v41, %v2626_v42 }
 0x108   : > { %v911_v48 = vrot.slane %v910_v43, 4 }
 0x109   : > { %v2631_v49 = vpop.xlane.xlu0 %476  ;;  %v2633_v50 = vpop.xlane.xlu1 %478 }
 0x10a   : > { %v912_v51 = vmax.f32 %v910_v43, %v911_v48  ;;  %v918_v54 = vmax.f32 %v917_v44, %v2631_v49 }
 0x10c   : > { %v913_v55 = vrot.slane %v912_v51, 2  ;;  %v919_v56 = vmax.f32 %v918_v54, %v2633_v50 }
 0x10d   : > { %v2637_v57 = vpop.xlane.xlu0 %480  ;;  %v2639_v45 = vpop.xlane.xlu1 %482 }
 0x10e   : > { %v914_v46 = vmax.f32 %v912_v51, %v913_v55  ;;  %v920_v58 = vmax.f32 %v919_v56, %v2637_v57 }
 0x110   : > { %v915_v52 = vrot.slane %v914_v46, 1  ;;  %v921_v53 = vmax.f32 %v920_v58, %v2639_v45 }
 0x111   : > { %v2643_v61 = vpop.xlane.xlu0 %484  ;;  %v2645_v62 = vpop.xlane.xlu1 %486 }
 0x112   : > { %v2647_v63 = vmax.f32 %v914_v46, %v915_v52  ;;  %v922_v0 = vmax.f32 %v921_v53, %v2643_v61 }
 0x114   : > { %v923_v1 = vmax.f32 %v922_v0, %v2645_v62  ;;  %v956_v2 = vsub.f32 %v2601_v14, %v2647_v63  ;;  %v957_v60 = vsub.f32 %v2605_v17, %v2647_v63  ;;  %v958_v32 = vsub.f32 %v2603_v16, %v2647_v63 }
 0x115   : > { %v2653_v3 = vpop.xlane.xlu0 %488  ;;  %v2655_v59 = vpop.xlane.xlu1 %490  ;;  %v959_v20 = vsub.f32 %v2607_v18, %v2647_v63  ;;  %v960_v30 = vsub.f32 %v2612_v21, %v2647_v63  ;;  %v961_v39 = vsub.f32 %v2614_v22, %v2647_v63  ;;  %v962_v54 = vsub.f32 %v2618_v28, %v2647_v63 }
 0x116   : > { %v924_v6 = vrot.slane %v923_v1, 4  ;;  %v930_v15 = vmax.f32 %v2653_v3, %v2655_v59  ;;  %v988_v5 = vmul.f32 1.442695, %v956_v2  ;;  %v990_v8 = vmul.f32 1.442695, %v957_v60 }
 0x117   : > { %v992_v19 = vmul.f32 1.442695, %v958_v32  ;;  %v994_v33 = vmul.f32 1.442695, %v959_v20  ;;  %v996_v38 = vmul.f32 1.442695, %v960_v30  ;;  %v963_v0 = vsub.f32 %v2620_v29, %v2647_v63 }
 0x118   : > { %v925_v4 = vmax.f32 %v923_v1, %v924_v6  ;;  %1955 = vpow2.f32 %v988_v5  ;;  %v998_v22 = vmul.f32 1.442695, %v961_v39  ;;  %v1000_v60 = vmul.f32 1.442695, %v962_v54 }
 0x119   : > { %v2661_v7 = vpop.xlane.xlu0 %492  ;;  %v2663_v12 = vpop.xlane.xlu1 %494  ;;  %1957 = vpow2.f32 %v990_v8  ;;  %v1002_v32 = vmul.f32 1.442695, %v963_v0 }
 0x11a   : > { %v926_v10 = vrot.slane %v925_v4, 2  ;;  %v931_v13 = vmax.f32 %v930_v15, %v2661_v7  ;;  %1959 = vpow2.f32 %v992_v19 }
 0x11b   : > { %1961 = vpow2.f32 %v994_v33 }
 0x11c   : > { %v927_v9 = vmax.f32 %v925_v4, %v926_v10  ;;  %v932_v11 = vmax.f32 %v931_v13, %v2663_v12  ;;  %1963 = vpow2.f32 %v996_v38 }
 0x11d   : > { %v2669_v14 = vpop.xlane.xlu0 %496  ;;  %v2671_v17 = vpop.xlane.xlu1 %498 }
 0x11e   : > { %v928_v23 = vrot.slane %v927_v9, 1  ;;  %v933_v16 = vmax.f32 %v932_v11, %v2669_v14 }
 0x120   : > { %v2676_v24 = vmax.f32 %v927_v9, %v928_v23  ;;  %v934_v25 = vmax.f32 %v933_v16, %v2671_v17 }
 0x121   : > { %v2679_v26 = vpop.xlane.xlu0 %500  ;;  %v2681_v27 = vpop.xlane.xlu1 %502 }
 0x122   : > { %v935_v31 = vmax.f32 %v934_v25, %v2679_v26  ;;  %v964_v18 = vsub.f32 %v2624_v41, %v2676_v24  ;;  %v965_v34 = vsub.f32 %v2626_v42, %v2676_v24  ;;  %v966_v41 = vsub.f32 %v2631_v49, %v2676_v24 }
 0x123   : > { %v967_v58 = vsub.f32 %v2633_v50, %v2676_v24  ;;  %v968_v5 = vsub.f32 %v2637_v57, %v2676_v24  ;;  %v969_v23 = vsub.f32 %v2639_v45, %v2676_v24 }
 0x124   : > { %v936_v35 = vmax.f32 %v935_v31, %v2681_v27  ;;  %v1004_v43 = vmul.f32 1.442695, %v964_v18  ;;  %v1006_v42 = vmul.f32 1.442695, %v965_v34  ;;  %v1008_v49 = vmul.f32 1.442695, %v966_v41 }
 0x125   : > { %v2691_v36 = vpop.xlane.xlu0 %504  ;;  %v2693_v37 = vpop.xlane.xlu1 %506  ;;  %v1010_v4 = vmul.f32 1.442695, %v967_v58  ;;  %v1012_v20 = vmul.f32 1.442695, %v968_v5  ;;  %v1014_v45 = vmul.f32 1.442695, %v969_v23  ;;  %v971_v41 = vsub.f32 %v2645_v62, %v2676_v24 }
 0x126   : > { %v937_v21 = vrot.slane %v936_v35, 4  ;;  %v943_v40 = vmax.f32 %v2691_v36, %v2693_v37  ;;  %v2701_v47 = vpop.eup %1955  ;;  %1965 = vpow2.f32 %v1004_v43 }
 0x127   : > { %v2709_v55 = vpop.eup %1957  ;;  %1967 = vpow2.f32 %v1006_v42  ;;  %v1018_v58 = vmul.f32 1.442695, %v971_v41 }
 0x128   : > { %v938_v44 = vmax.f32 %v936_v35, %v937_v21  ;;  %v1052_v2 = vadd.f32 %v2709_v55, %v2701_v47  ;;  %1969 = vpow2.f32 %v998_v22  ;;  %v2723_v6 = vpop.eup %1959 }
 0x129   : > { %v2703_v48 = vpop.xlane.xlu0 %508  ;;  %v2705_v51 = vpop.xlane.xlu1 %510  ;;  %1971 = vpow2.f32 %v1008_v49 }
 0x12a   : > { %v939_v56 = vrot.slane %v938_v44, 2  ;;  %v944_v46 = vmax.f32 %v943_v40, %v2703_v48  ;;  %v1053_v13 = vadd.f32 %v2723_v6, %v1052_v2  ;;  %1973 = vpow2.f32 %v1000_v60  ;;  %v2736_v9 = vpop.eup %1961 }
 0x12b   : > { %1975 = vpow2.f32 %v1010_v4  ;;  %v2749_v31 = vpop.eup %1963 }
 0x12c   : > { %v940_v52 = vmax.f32 %v938_v44, %v939_v56  ;;  %v945_v53 = vmax.f32 %v944_v46, %v2705_v51  ;;  %1977 = vpow2.f32 %v1002_v32  ;;  %v1054_v30 = vadd.f32 %v2736_v9, %v1053_v13 }
 0x12d   : > { %v2717_v28 = vpop.xlane.xlu0 %512  ;;  %v2719_v1 = vpop.xlane.xlu1 %514  ;;  %1979 = vpow2.f32 %v1012_v20 }
 0x12e   : > { %v941_v15 = vrot.slane %v940_v52, 1  ;;  %v946_v50 = vmax.f32 %v945_v53, %v2717_v28  ;;  %v1055_v21 = vadd.f32 %v2749_v31, %v1054_v30 }
 0x130   : > { %v2728_v29 = vmax.f32 %v940_v52, %v941_v15  ;;  %v947_v63 = vmax.f32 %v946_v50, %v2719_v1 }
 0x131   : > { %v2731_v8 = vpop.xlane.xlu0 %516  ;;  %v2733_v10 = vpop.xlane.xlu1 %518 }
 0x132   : > { %v948_v11 = vmax.f32 %v947_v63, %v2731_v8  ;;  %v972_v19 = vsub.f32 %v2653_v3, %v2728_v29  ;;  %v973_v57 = vsub.f32 %v2655_v59, %v2728_v29  ;;  %v974_v25 = vsub.f32 %v2661_v7, %v2728_v29 }
 0x133   : > { %v2751_v34 = vpop.eup %1965  ;;  %v970_v59 = vsub.f32 %v2643_v61, %v2676_v24  ;;  %v975_v7 = vsub.f32 %v2663_v12, %v2728_v29  ;;  %v976_v12 = vsub.f32 %v2669_v14, %v2728_v29  ;;  %v977_v14 = vsub.f32 %v2671_v17, %v2728_v29 }
 0x134   : > { %v949_v16 = vmax.f32 %v948_v11, %v2733_v10  ;;  %v1020_v33 = vmul.f32 1.442695, %v972_v19  ;;  %v1022_v18 = vmul.f32 1.442695, %v973_v57  ;;  %v2755_v35 = vpop.eup %1967  ;;  %v1024_v39 = vmul.f32 1.442695, %v974_v25 }
 0x135   : > { %v2760_v40 = vpop.eup %1969  ;;  %v1065_v61 = vadd.f32 %v2755_v35, %v2751_v34  ;;  %v1016_v42 = vmul.f32 1.442695, %v970_v59  ;;  %v1026_v22 = vmul.f32 1.442695, %v975_v7  ;;  %v1028_v53 = vmul.f32 1.442695, %v976_v12 }
 0x136   : > { %v950_v3 = vrot.slane %v949_v16, 4  ;;  %1981 = vpow2.f32 %v1020_v33  ;;  %v2766_v44 = vpop.eup %1971  ;;  %v1056_v56 = vadd.f32 %v2760_v40, %v1055_v21  ;;  %v978_v5 = vsub.f32 %v2679_v26, %v2728_v29 }
 0x137   : > { %1983 = vpow2.f32 %v1022_v18  ;;  %v2771_v46 = vpop.eup %1973  ;;  %v1066_v62 = vadd.f32 %v2766_v44, %v1065_v61  ;;  %v1030_v17 = vmul.f32 1.442695, %v977_v14  ;;  %v979_v26 = vsub.f32 %v2681_v27, %v2728_v29 }
 0x138   : > { %v951_v38 = vmax.f32 %v949_v16, %v950_v3  ;;  %1985 = vpow2.f32 %v1014_v45  ;;  %v2774_v24 = vpop.eup %1975  ;;  %v1057_v0 = vadd.f32 %v2771_v46, %v1056_v56  ;;  %v1032_v25 = vmul.f32 1.442695, %v978_v5 }
 0x139   : > { %1987 = vpow2.f32 %v1024_v39  ;;  %v2781_v2 = vpop.eup %1977  ;;  %v1067_v50 = vadd.f32 %v2774_v24, %v1066_v62  ;;  %v1034_v45 = vmul.f32 1.442695, %v979_v26 }
 0x13a   : > { %v952_v43 = vrot.slane %v951_v38, 2  ;;  %1989 = vpow2.f32 %v1016_v42  ;;  %v2788_v4 = vpop.eup %1979  ;;  %v1058_v63 = vadd.f32 %v2781_v2, %v1057_v0 }
 0x13b   : > { %1991 = vpow2.f32 %v1026_v22  ;;  %v1068_v19 = vadd.f32 %v2788_v4, %v1067_v50 }
 0x13c   : > { %v953_v54 = vmax.f32 %v951_v38, %v952_v43  ;;  %1993 = vpow2.f32 %v1018_v58  ;;  %v1059_v33 = vrot.slane %v1058_v63, 4  ;;  %v2818_v38 = vld [vmem:[%s3130_s3] ss:$0 sm:$0xff] }
 0x13d   : > { %1995 = vpow2.f32 %v1028_v53 }
 0x13e   : > { %v954_v49 = vrot.slane %v953_v54, 1  ;;  %1997 = vpow2.f32 %v1030_v17 }
 0x140   : > { %v2776_v52 = vmax.f32 %v953_v54, %v954_v49 }
 0x142   : > { %v980_v60 = vsub.f32 %v2691_v36, %v2776_v52  ;;  %v981_v15 = vsub.f32 %v2693_v37, %v2776_v52  ;;  %v982_v36 = vsub.f32 %v2703_v48, %v2776_v52  ;;  %v983_v48 = vsub.f32 %v2705_v51, %v2776_v52 }
 0x143   : > { %v2793_v32 = vpop.eup %1981  ;;  %v1060_v51 = vadd.f32 %v1059_v33, %v1058_v63  ;;  %v984_v61 = vsub.f32 %v2717_v28, %v2776_v52  ;;  %v985_v62 = vsub.f32 %v2719_v1, %v2776_v52 }
 0x144   : > { %v1036_v13 = vmul.f32 1.442695, %v980_v60  ;;  %v2795_v11 = vpop.eup %1983  ;;  %v1038_v37 = vmul.f32 1.442695, %v981_v15  ;;  %v1040_v3 = vmul.f32 1.442695, %v982_v36 }
 0x145   : > { %v2800_v57 = vpop.eup %1985  ;;  %v1078_v16 = vadd.f32 %v2795_v11, %v2793_v32  ;;  %v1042_v42 = vmul.f32 1.442695, %v983_v48  ;;  %v1061_v14 = vrot.slane %v1060_v51, 2  ;;  %v1044_v17 = vmul.f32 1.442695, %v984_v61 }
 0x146   : > { %v2808_v30 = vpop.eup %1987  ;;  %1999 = vpow2.f32 %v1036_v13  ;;  %v1069_v27 = vadd.f32 %v2800_v57, %v1068_v19 }
 0x147   : > { %2001 = vpow2.f32 %v1038_v37  ;;  %v2813_v29 = vpop.eup %1989  ;;  %v1079_v21 = vadd.f32 %v2808_v30, %v1078_v16  ;;  %v1062_v33 = vadd.f32 %v1061_v14, %v1060_v51 }
 0x148   : > { %2003 = vpow2.f32 %v1032_v25  ;;  %v2823_v43 = vpop.eup %1991  ;;  %v1070_v12 = vadd.f32 %v2813_v29, %v1069_v27 }
 0x149   : > { %v1732_v20 = vpop.f32.mrf.mxu0  ;;  %v2804_v23 = vpop.f32.mrf.mxu1  ;;  %2005 = vpow2.f32 %v1040_v3  ;;  %v1080_v28 = vadd.f32 %v2823_v43, %v1079_v21  ;;  %v1046_v3 = vmul.f32 1.442695, %v985_v62  ;;  %v1063_v62 = vrot.slane %v1062_v33, 1 }
 0x14a   : > { %v2829_v56 = vpop.eup %1993  ;;  %v594_v49 = vadd.f32 %v1732_v20, %v2818_v38  ;;  %2007 = vpow2.f32 %v1034_v45  ;;  %v658_v51 = vadd.f32 %v2804_v23, %v2818_v38 }
 0x14b   : > { %v585_v18 = vpop.f32.mrf.mxu0  ;;  %v649_v59 = vpop.f32.mrf.mxu1  ;;  %2009 = vpow2.f32 %v1042_v42  ;;  %v1071_v36 = vadd.f32 %v2829_v56, %v1070_v12 }
 0x14c   : > { %v586_v41 = vadd.f32 %v2818_v38, %v585_v18  ;;  %v2838_v60 = vpop.eup %1995  ;;  %v1110_v37 = vmul.f32 %v2723_v6, %v594_v49  ;;  %v650_v19 = vadd.f32 %v2818_v38, %v649_v59  ;;  %2011 = vpow2.f32 %v1044_v17 }
 0x14d   : > { %v1733_v39 = vpop.f32.mrf.mxu0  ;;  %v2820_v7 = vpop.f32.mrf.mxu1  ;;  %v1072_v21 = vrot.slane %v1071_v36, 4  ;;  %2013 = vpow2.f32 %v1046_v3 }
 0x14e   : > { %v1108_v15 = vmul.f32 %v2701_v47, %v586_v41  ;;  %v597_v50 = vadd.f32 %v1733_v39, %v2818_v38  ;;  %v986_v47 = vsub.f32 %v2731_v8, %v2776_v52  ;;  %v2855_v48 = vpop.eup %1997  ;;  %v987_v8 = vsub.f32 %v2733_v10, %v2776_v52 }
 0x14f   : > { %v588_v54 = vpop.f32.mrf.mxu0  ;;  %v652_v22 = vpop.f32.mrf.mxu1  ;;  %v1124_v61 = vmul.f32 %v2793_v32, %v650_v19 }
 0x150   : > { %v589_v58 = vadd.f32 %v2818_v38, %v588_v54  ;;  %v653_v63 = vadd.f32 %v2818_v38, %v652_v22  ;;  %v1111_v18 = vmul.f32 %v2736_v9, %v597_v50  ;;  %v1050_v17 = vmul.f32 1.442695, %v987_v8 }
 0x151   : > { %v1736_v53 = vpop.f32.mrf.mxu0  ;;  %v2835_v0 = vpop.f32.mrf.mxu1 }
 0x152   : > { %v1109_v5 = vmul.f32 %v2709_v55, %v589_v58  ;;  %v1081_v55 = vadd.f32 %v2838_v60, %v1080_v28  ;;  %v1125_v59 = vmul.f32 %v2795_v11, %v653_v63  ;;  %v1048_v11 = vmul.f32 1.442695, %v986_v47 }
 0x153   : > { %v601_v13 = vpop.f32.mrf.mxu0  ;;  %v2844_v1 = vpop.f32.mrf.mxu1  ;;  %v610_v54 = vadd.f32 %v1736_v53, %v2818_v38  ;;  %v661_v63 = vadd.f32 %v2820_v7, %v2818_v38 }
 0x154   : > { %v1140_v26 = vadd.f32 %v1109_v5, %v1108_v15  ;;  %v602_v20 = vadd.f32 %v2818_v38, %v601_v13  ;;  %v2859_v27 = vpop.eup %1999  ;;  %v1082_v10 = vadd.f32 %v2855_v48, %v1081_v55  ;;  %v1166_v58 = vadd.f32 %v1125_v59, %v1124_v61 }
 0x155   : > { %v1737_v16 = vpop.f32.mrf.mxu0  ;;  %v2853_v25 = vpop.f32.mrf.mxu1  ;;  %v1073_v15 = vadd.f32 %v1072_v21, %v1071_v36  ;;  %v1126_v5 = vmul.f32 %v2808_v30, %v658_v51  ;;  %v1114_v13 = vmul.f32 %v2771_v46, %v610_v54  ;;  %2015 = vpow2.f32 %v1048_v11 }
 0x156   : > { %v1141_v6 = vadd.f32 %v1140_v26, %v1110_v37  ;;  %v2863_v41 = vpop.eup %2001  ;;  %v1112_v9 = vmul.f32 %v2749_v31, %v602_v20  ;;  %v613_v32 = vadd.f32 %v1737_v16, %v2818_v38  ;;  %v1064_v20 = vadd.f32 %v1063_v62, %v1062_v33 }
 0x157   : > { %v604_v45 = vpop.f32.mrf.mxu0  ;;  %v668_v39 = vpop.f32.mrf.mxu1  ;;  %v1091_v31 = vadd.f32 %v2863_v41, %v2859_v27  ;;  %v1167_v36 = vadd.f32 %v1166_v58, %v1126_v5  ;;  %v1127_v59 = vmul.f32 %v2823_v43, %v661_v63  ;;  %v666_v8 = vadd.f32 %v2818_v38, %v2844_v1 }
 0x158   : > { %v1142_v42 = vadd.f32 %v1141_v6, %v1111_v18  ;;  %v605_v22 = vadd.f32 %v2818_v38, %v604_v45  ;;  %v2874_v49 = vpop.eup %2003  ;;  %v1115_v7 = vmul.f32 %v2781_v2, %v613_v32  ;;  %v1074_v18 = vrot.slane %v1073_v15, 2 }
 0x159   : > { %v1740_v52 = vpop.f32.mrf.mxu0  ;;  %v2872_v12 = vpop.f32.mrf.mxu1  ;;  %v1083_v19 = vadd.f32 %v2874_v49, %v1082_v10  ;;  %2017 = vpow2.f32 %v1050_v17 }
 0x15a   : > { %v1143_v23 = vadd.f32 %v1142_v42, %v1112_v9  ;;  %v1113_v53 = vmul.f32 %v2760_v40, %v605_v22  ;;  %v2880_v50 = vpop.eup %2005  ;;  %v626_v45 = vadd.f32 %v1740_v52, %v2818_v38  ;;  %v1168_v9 = vadd.f32 %v1167_v36, %v1127_v59 }
 0x15b   : > { %v617_v28 = vpop.f32.mrf.mxu0  ;;  %v681_v14 = vpop.f32.mrf.mxu1  ;;  %v1092_v30 = vadd.f32 %v2880_v50, %v1091_v31  ;;  %2019 = vrcp.f32 %v1064_v20  ;;  %v669_v22 = vadd.f32 %v2818_v38, %v668_v39  ;;  %v1075_v31 = vadd.f32 %v1074_v18, %v1073_v15 }
 0x15c   : > { %v1144_v37 = vadd.f32 %v1143_v23, %v1113_v53  ;;  %v2889_v40 = vpop.eup %2007  ;;  %v618_v55 = vadd.f32 %v2818_v38, %v617_v28  ;;  %v1128_v23 = vmul.f32 %v2838_v60, %v666_v8  ;;  %v1118_v62 = vmul.f32 %v2766_v44, %v626_v45 }
 0x15d   : > { %v1741_v26 = vpop.f32.mrf.mxu0  ;;  %v2887_v47 = vpop.f32.mrf.mxu1  ;;  %v1084_v51 = vadd.f32 %v2889_v40, %v1083_v19  ;;  %v1129_v15 = vmul.f32 %v2855_v48, %v669_v22  ;;  %v682_v19 = vadd.f32 %v2818_v38, %v681_v14  ;;  %v674_v20 = vadd.f32 %v2835_v0, %v2818_v38 }
 0x15e   : > { %v1145_v16 = vadd.f32 %v1144_v37, %v1114_v13  ;;  %v2894_v6 = vpop.eup %2009  ;;  %v1116_v42 = vmul.f32 %v2751_v34, %v618_v55  ;;  %v629_v11 = vadd.f32 %v1741_v26, %v2818_v38  ;;  %v1169_v39 = vadd.f32 %v1168_v9, %v1128_v23 }
 0x15f   : > { %v620_v3 = vpop.f32.mrf.mxu0  ;;  %v684_v46 = vpop.f32.mrf.mxu1  ;;  %v1093_v1 = vadd.f32 %v2894_v6, %v1092_v30  ;;  %v1085_v53 = vrot.slane %v1084_v51, 4  ;;  %v690_v14 = vadd.f32 %v2872_v12, %v2818_v38  ;;  %v693_v22 = vadd.f32 %v2887_v47, %v2818_v38 }
 0x160   : > { %v621_v33 = vadd.f32 %v2818_v38, %v620_v3  ;;  %v1146_v21 = vadd.f32 %v1145_v16, %v1115_v7  ;;  %v2911_v58 = vpop.eup %2011  ;;  %v1119_v17 = vmul.f32 %v2774_v24, %v629_v11  ;;  %v1076_v24 = vrot.slane %v1075_v31, 1 }
 0x161   : > { %v1744_v2 = vpop.f32.mrf.mxu0  ;;  %v2902_v61 = vpop.f32.mrf.mxu1  ;;  %v1094_v60 = vadd.f32 %v2911_v58, %v1093_v1  ;;  %v677_v7 = vadd.f32 %v2853_v25, %v2818_v38  ;;  %v1086_v3 = vadd.f32 %v1085_v53, %v1084_v51  ;;  %v1132_v25 = vmul.f32 %v2859_v27, %v682_v19 }
 0x162   : > { %v1117_v43 = vmul.f32 %v2755_v35, %v621_v33  ;;  %v1147_v54 = vrot.slane %v1146_v21, 4  ;;  %v685_v35 = vadd.f32 %v2818_v38, %v684_v46  ;;  %v2920_v37 = vpop.eup %2013  ;;  %v642_v18 = vadd.f32 %v1744_v2, %v2818_v38  ;;  %v2947_v2 = vld [vmem:[%s3132_s5] ss:$0 sm:$0xff] }
 0x163   : > { %v633_v10 = vpop.f32.mrf.mxu0  ;;  %v2909_v52 = vpop.f32.mrf.mxu1  ;;  %v1170_v33 = vadd.f32 %v1169_v39, %v1129_v15  ;;  %v1077_v9 = vadd.f32 %v1076_v24, %v1075_v31 }
 0x164   : > { %v1153_v34 = vadd.f32 %v1117_v43, %v1116_v42  ;;  %v1148_v32 = vadd.f32 %v1147_v54, %v1146_v21  ;;  %v634_v28 = vadd.f32 %v2818_v38, %v633_v10  ;;  %v1133_v46 = vmul.f32 %v2863_v41, %v685_v35  ;;  %v2937_v8 = vpop.eup %2015 }
 0x165   : > { %v1745_v5 = vpop.f32.mrf.mxu0  ;;  %v2917_v63 = vpop.f32.mrf.mxu1  ;;  %v1130_v41 = vmul.f32 %v2874_v49, %v674_v20  ;;  %v1131_v42 = vmul.f32 %v2889_v40, %v677_v7  ;;  %v1087_v49 = vrot.slane %v1086_v3, 2  ;;  %2021 = vrcp.f32 %v1077_v9 }
 0x166   : > { %v1154_v13 = vadd.f32 %v1153_v34, %v1118_v62  ;;  %v1149_v44 = vrot.slane %v1148_v32, 2  ;;  %v1120_v55 = vmul.f32 %v2788_v4, %v634_v28  ;;  %v1095_v4 = vadd.f32 %v2920_v37, %v1094_v60  ;;  %v2951_v54 = vpop.eup %2017 }
 0x167   : > { %v636_v26 = vpop.f32.mrf.mxu0  ;;  %v2925_v36 = vpop.f32.mrf.mxu1  ;;  %v645_v51 = vadd.f32 %v1745_v5, %v2818_v38  ;;  %v1179_v43 = vadd.f32 %v1133_v46, %v1132_v25  ;;  %v1171_v62 = vadd.f32 %v1170_v33, %v1130_v41  ;;  %v1134_v34 = vmul.f32 %v2880_v50, %v690_v14 }
 0x168   : > { %v1155_v30 = vadd.f32 %v1154_v13, %v1119_v17  ;;  %v1150_v16 = vadd.f32 %v1149_v44, %v1148_v32  ;;  %v637_v0 = vadd.f32 %v2818_v38, %v636_v26  ;;  %v1096_v23 = vadd.f32 %v2937_v8, %v1095_v4  ;;  %v2020_v32 = vpop.eup %2019 }
 0x169   : > { %v1780_v48 = vpop.f32.mrf.mxu1  ;;  %v1123_v53 = vmul.f32 %v2829_v56, %v645_v51  ;;  %v1180_v39 = vadd.f32 %v1179_v43, %v1134_v34  ;;  %v1088_v60 = vadd.f32 %v1087_v49, %v1086_v3  ;;  %v1135_v44 = vmul.f32 %v2894_v6, %v693_v22 }
 0x16a   : > { %v1156_v59 = vadd.f32 %v1155_v30, %v1120_v55  ;;  %v1151_v45 = vrot.slane %v1150_v16, 1  ;;  %v1121_v12 = vmul.f32 %v2800_v57, %v637_v0  ;;  %v1122_v57 = vmul.f32 %v2813_v29, %v642_v18 }
 0x16b   : > { %v777_v21 = vpop.f32.mrf.mxu1  ;;  %v786_v28 = vadd.f32 %v1780_v48, %v2947_v2  ;;  %v1097_v19 = vadd.f32 %v2951_v54, %v1096_v23  ;;  %v1172_v26 = vadd.f32 %v1171_v62, %v1131_v42  ;;  %v698_v56 = vadd.f32 %v2818_v38, %v2909_v52 }
 0x16c   : > { %v1152_v11 = vadd.f32 %v1151_v45, %v1150_v16  ;;  %v778_v1 = vadd.f32 %v2947_v2, %v777_v21  ;;  %v1157_v10 = vadd.f32 %v1156_v59, %v1121_v12  ;;  %v1181_v16 = vadd.f32 %v1180_v39, %v1135_v44 }
 0x16d   : > { %v1781_v27 = vpop.f32.mrf.mxu1  ;;  %v1198_v30 = vmax.f32 %v786_v28, 0.0  ;;  %v701_v3 = vadd.f32 %v2818_v38, %v2925_v36  ;;  %v1098_v0 = vrot.slane %v1097_v19, 4  ;;  %v1136_v4 = vmul.f32 %v2911_v58, %v698_v56 }
 0x16e   : > { %v789_v40 = vadd.f32 %v1781_v27, %v2947_v2  ;;  %v1158_v35 = vadd.f32 %v1157_v10, %v1122_v57  ;;  %v1192_v47 = vmul.f32 %v2020_v32, %v1152_v11  ;;  %v1196_v29 = vmax.f32 %v778_v1, 0.0 }
 0x16f   : > { %v780_v31 = vpop.f32.mrf.mxu1  ;;  %v1173_v51 = vrot.slane %v1172_v26, 4  ;;  %v1182_v9 = vadd.f32 %v1181_v16, %v1136_v4  ;;  %v1137_v12 = vmul.f32 %v2920_v37, %v701_v3  ;;  %v1089_v43 = vrot.slane %v1088_v60, 1 }
 0x170   : > { %v781_v5 = vadd.f32 %v2947_v2, %v780_v31  ;;  %v1199_v17 = vmax.f32 %v789_v40, 0.0  ;;  %v1159_v50 = vadd.f32 %v1158_v35, %v1123_v53  ;;  %v1228_v46 = vmul.f32 %v1196_v29, %v1192_v47 }
 0x171   : > { %v1784_v13 = vpop.f32.mrf.mxu1  ;;  %v1230_v18 = vmul.f32 %v1198_v30, %v1192_v47  ;;  %v1099_v58 = vadd.f32 %v1098_v0, %v1097_v19  ;;  %v706_v22 = vadd.f32 %v2902_v61, %v2818_v38  ;;  %v1174_v34 = vadd.f32 %v1173_v51, %v1172_v26 }
 0x172   : > { %v1197_v15 = vmax.f32 %v781_v5, 0.0  ;;  %v1160_v55 = vrot.slane %v1159_v50, 4  ;;  %v1231_v24 = vmul.f32 %v1199_v17, %v1192_v47  ;;  %v802_v59 = vadd.f32 %v1784_v13, %v2947_v2  ;;  %v2022_v44 = vpop.eup %2021 }
 0x173   : > { %v793_v20 = vpop.f32.mrf.mxu1  ;;  %v1183_v40 = vadd.f32 %v1182_v9, %v1137_v12  ;;  %v1090_v53 = vadd.f32 %v1089_v43, %v1088_v60  ;;  %v1100_v39 = vrot.slane %v1099_v58, 2  ;;  %v1138_v29 = vmul.f32 %v2937_v8, %v706_v22 }
 0x174   : > { %v1229_v7 = vmul.f32 %v1197_v15, %v1192_v47  ;;  %v794_v6 = vadd.f32 %v2947_v2, %v793_v20  ;;  %v1161_v14 = vadd.f32 %v1160_v55, %v1159_v50  ;;  %v1261_v21 = vpack.c.bf16 %v1231_v24, %v1230_v18 }
 0x175   : > { %v1785_v48 = vpop.f32.mrf.mxu1  ;;  %v1202_v27 = vmax.f32 %v802_v59, 0.0  ;;  %v709_v61 = vadd.f32 %v2917_v63, %v2818_v38  ;;  %v1175_v60 = vrot.slane %v1174_v34, 2  ;;  %2023 = vrcp.f32 %v1090_v53 }
 0x176   : > { %v805_v52 = vadd.f32 %v1785_v48, %v2947_v2  ;;  %v1260_v33 = vpack.c.bf16 %v1229_v7, %v1228_v46  ;;  %v1162_v25 = vrot.slane %v1161_v14, 2  ;;  %v1200_v42 = vmax.f32 %v794_v6, 0.0 }
 0x177   : > { %v796_v45 = vpop.f32.mrf.mxu1  ;;  %v1234_v28 = vmul.f32 %v1202_v27, %v1192_v47  ;;  %v1139_v8 = vmul.f32 %v2951_v54, %v709_v61  ;;  %v1101_v30 = vadd.f32 %v1100_v39, %v1099_v58  ;;  %v1176_v3 = vadd.f32 %v1175_v60, %v1174_v34 }
 0x178   : > { %v1203_v41 = vmax.f32 %v805_v52, 0.0  ;;  %v797_v36 = vadd.f32 %v2947_v2, %v796_v45  ;;  %1826 = vmatprep.mubr.bf16.mxu0 %v1260_v33  ;;  %v1163_v1 = vadd.f32 %v1162_v25, %v1161_v14  ;;  %v1232_v31 = vmul.f32 %v1200_v42, %v1192_v47 }
 0x179   : > { %v1788_v11 = vpop.f32.mrf.mxu1  ;;  %1827 = vmatmul.mubr.bf16.vlgmr.msra.gmra.mxu0 %v1261_v21  ;;  %v1102_v21 = vrot.slane %v1101_v30, 1 }
 0x17a   : > { %v1201_v49 = vmax.f32 %v797_v36, 0.0  ;;  %v1164_v10 = vrot.slane %v1163_v1, 1  ;;  %v1235_v23 = vmul.f32 %v1203_v41, %v1192_v47  ;;  %v818_v50 = vadd.f32 %v1788_v11, %v2947_v2 }
 0x17b   : > { %v809_v57 = vpop.f32.mrf.mxu1  ;;  %v1177_v41 = vrot.slane %v1176_v3, 1 }
 0x17c   : > { %v1233_v62 = vmul.f32 %v1201_v49, %v1192_v47  ;;  %v810_v37 = vadd.f32 %v2947_v2, %v809_v57  ;;  %v1165_v35 = vadd.f32 %v1164_v10, %v1163_v1  ;;  %v1263_v26 = vpack.c.bf16 %v1235_v23, %v1234_v28 }
 0x17d   : > { %v1789_v32 = vpop.f32.mrf.mxu1  ;;  %v1184_v47 = vadd.f32 %v1183_v40, %v1138_v29  ;;  %v1206_v24 = vmax.f32 %v818_v50, 0.0  ;;  %v1103_v49 = vadd.f32 %v1102_v21, %v1101_v30  ;;  %v1178_v58 = vadd.f32 %v1177_v41, %v1176_v3 }
 0x17e   : > { %v821_v5 = vadd.f32 %v1789_v32, %v2947_v2  ;;  %v1262_v13 = vpack.c.bf16 %v1233_v62, %v1232_v31  ;;  %v1193_v56 = vmul.f32 %v2022_v44, %v1165_v35  ;;  %v1204_v20 = vmax.f32 %v810_v37, 0.0 }
 0x17f   : > { %v812_v17 = vpop.f32.mrf.mxu1  ;;  %v1185_v46 = vadd.f32 %v1184_v47, %v1139_v8  ;;  %2025 = vrcp.f32 %v1103_v49 }
 0x180   : > { %v1207_v15 = vmax.f32 %v821_v5, 0.0  ;;  %v813_v19 = vadd.f32 %v2947_v2, %v812_v17  ;;  %1830 = vmatprep.mubr.bf16.mxu0 %v1262_v13  ;;  %v1236_v6 = vmul.f32 %v1204_v20, %v1193_v56  ;;  %v1238_v18 = vmul.f32 %v1206_v24, %v1193_v56 }
 0x181   : > { %v1792_v55 = vpop.f32.mrf.mxu1  ;;  %1831 = vmatmul.mubr.bf16.gmra.mxu0 %v1263_v26  ;;  %v1186_v36 = vrot.slane %v1185_v46, 4 }
 0x182   : > { %v1205_v38 = vmax.f32 %v813_v19, 0.0  ;;  %v1239_v7 = vmul.f32 %v1207_v15, %v1193_v56  ;;  %v834_v59 = vadd.f32 %v1792_v55, %v2947_v2  ;;  %v2024_v40 = vpop.eup %2023 }
 0x183   : > { %v825_v63 = vpop.f32.mrf.mxu1  ;;  %v1187_v22 = vadd.f32 %v1186_v36, %v1185_v46  ;;  %v1194_v39 = vmul.f32 %v2024_v40, %v1178_v58 }
 0x184   : > { %v826_v16 = vadd.f32 %v2947_v2, %v825_v63  ;;  %v1237_v48 = vmul.f32 %v1205_v38, %v1193_v56  ;;  %v1265_v25 = vpack.c.bf16 %v1239_v7, %v1238_v18  ;;  %v1210_v9 = vmax.f32 %v834_v59, 0.0 }
 0x185   : > { %v1793_v14 = vpop.f32.mrf.mxu1  ;;  %v1188_v28 = vrot.slane %v1187_v22, 2 }
 0x186   : > { %v837_v52 = vadd.f32 %v1793_v14, %v2947_v2  ;;  %v1264_v4 = vpack.c.bf16 %v1237_v48, %v1236_v6  ;;  %v1208_v54 = vmax.f32 %v826_v16, 0.0  ;;  %v1242_v10 = vmul.f32 %v1210_v9, %v1193_v56 }
 0x187   : > { %v828_v0 = vpop.f32.mrf.mxu1  ;;  %v1189_v19 = vadd.f32 %v1188_v28, %v1187_v22 }
 0x188   : > { %v1211_v45 = vmax.f32 %v837_v52, 0.0  ;;  %v829_v33 = vadd.f32 %v2947_v2, %v828_v0  ;;  %1834 = vmatprep.mubr.bf16.mxu0 %v1264_v4  ;;  %v1240_v11 = vmul.f32 %v1208_v54, %v1193_v56 }
 0x189   : > { %v1796_v51 = vpop.f32.mrf.mxu1  ;;  %1835 = vmatmul.mubr.bf16.gmra.mxu0 %v1265_v25  ;;  %v1190_v24 = vrot.slane %v1189_v19, 1 }
 0x18a   : > { %v1209_v12 = vmax.f32 %v829_v33, 0.0  ;;  %v1243_v43 = vmul.f32 %v1211_v45, %v1193_v56  ;;  %v850_v23 = vadd.f32 %v1796_v51, %v2947_v2 }
 0x18b   : > { %v841_v42 = vpop.f32.mrf.mxu1  ;;  %v1191_v59 = vadd.f32 %v1190_v24, %v1189_v19 }
 0x18c   : > { %v1241_v1 = vmul.f32 %v1209_v12, %v1193_v56  ;;  %v842_v27 = vadd.f32 %v2947_v2, %v841_v42  ;;  %v1267_v35 = vpack.c.bf16 %v1243_v43, %v1242_v10  ;;  %v1214_v29 = vmax.f32 %v850_v23, 0.0  ;;  %v2026_v33 = vpop.eup %2025 }
 0x18d   : > { %v1797_v57 = vpop.f32.mrf.mxu1  ;;  %v1195_v12 = vmul.f32 %v2026_v33, %v1191_v59 }
 0x18e   : > { %v853_v62 = vadd.f32 %v1797_v57, %v2947_v2  ;;  %v1266_v34 = vpack.c.bf16 %v1241_v1, %v1240_v11  ;;  %v1212_v37 = vmax.f32 %v842_v27, 0.0  ;;  %v1246_v60 = vmul.f32 %v1214_v29, %v1194_v39 }
 0x18f   : > { %v844_v31 = vpop.f32.mrf.mxu1 }
 0x190   : > { %v1215_v32 = vmax.f32 %v853_v62, 0.0  ;;  %v845_v53 = vadd.f32 %v2947_v2, %v844_v31  ;;  %1838 = vmatprep.mubr.bf16.mxu0 %v1266_v34  ;;  %v1244_v13 = vmul.f32 %v1212_v37, %v1194_v39 }
 0x191   : > { %v1800_v5 = vpop.f32.mrf.mxu1  ;;  %1839 = vmatmul.mubr.bf16.gmra.mxu0 %v1267_v35 }
 0x192   : > { %v1213_v61 = vmax.f32 %v845_v53, 0.0  ;;  %v1247_v44 = vmul.f32 %v1215_v32, %v1194_v39  ;;  %v866_v56 = vadd.f32 %v1800_v5, %v2947_v2 }
 0x193   : > { %v857_v17 = vpop.f32.mrf.mxu1 }
 0x194   : > { %v1245_v50 = vmul.f32 %v1213_v61, %v1194_v39  ;;  %v858_v15 = vadd.f32 %v2947_v2, %v857_v17  ;;  %v1269_v30 = vpack.c.bf16 %v1247_v44, %v1246_v60  ;;  %v1218_v16 = vmax.f32 %v866_v56, 0.0 }
 0x195   : > { %v1801_v26 = vpop.f32.mrf.mxu1 }
 0x196   : > { %v869_v47 = vadd.f32 %v1801_v26, %v2947_v2  ;;  %v1268_v20 = vpack.c.bf16 %v1245_v50, %v1244_v13  ;;  %v1216_v8 = vmax.f32 %v858_v15, 0.0  ;;  %v1250_v0 = vmul.f32 %v1218_v16, %v1194_v39  ;;  %v3007_v13 = vld [vmem:[%s3134_s7] ss:$0 sm:$0xff] }
 0x197   : > { %v860_v55 = vpop.f32.mrf.mxu1 }
 0x198   : > { %v1219_v38 = vmax.f32 %v869_v47, 0.0  ;;  %v861_v63 = vadd.f32 %v2947_v2, %v860_v55  ;;  %1842 = vmatprep.mubr.bf16.mxu0 %v1268_v20  ;;  %v1248_v6 = vmul.f32 %v1216_v8, %v1194_v39 }
 0x199   : > { %v1804_v7 = vpop.f32.mrf.mxu1  ;;  %1843 = vmatmul.mubr.bf16.gmra.mxu0 %v1269_v30 }
 0x19a   : > { %v1217_v3 = vmax.f32 %v861_v63, 0.0  ;;  %v1251_v48 = vmul.f32 %v1219_v38, %v1194_v39  ;;  %v882_v4 = vadd.f32 %v1804_v7, %v2947_v2 }
 0x19b   : > { %v873_v46 = vpop.f32.mrf.mxu1 }
 0x19c   : > { %v1249_v14 = vmul.f32 %v1217_v3, %v1194_v39  ;;  %v874_v18 = vadd.f32 %v2947_v2, %v873_v46  ;;  %v1271_v51 = vpack.c.bf16 %v1251_v48, %v1250_v0  ;;  %v1222_v42 = vmax.f32 %v882_v4, 0.0 }
 0x19d   : > { %v1805_v52 = vpop.f32.mrf.mxu1 }
 0x19e   : > { %v885_v54 = vadd.f32 %v1805_v52, %v2947_v2  ;;  %v1270_v45 = vpack.c.bf16 %v1249_v14, %v1248_v6  ;;  %v1220_v21 = vmax.f32 %v874_v18, 0.0  ;;  %v1254_v57 = vmul.f32 %v1222_v42, %v1195_v12 }
 0x19f   : > { %v876_v25 = vpop.f32.mrf.mxu1 }
 0x1a0   : > { %v1223_v41 = vmax.f32 %v885_v54, 0.0  ;;  %v877_v36 = vadd.f32 %v2947_v2, %v876_v25  ;;  %1846 = vmatprep.mubr.bf16.mxu0 %v1270_v45  ;;  %v1252_v1 = vmul.f32 %v1220_v21, %v1195_v12 }
 0x1a1   : > { %v1808_v9 = vpop.f32.mrf.mxu1  ;;  %1847 = vmatmul.mubr.bf16.gmra.mxu0 %v1271_v51 }
 0x1a2   : > { %v1221_v11 = vmax.f32 %v877_v36, 0.0  ;;  %v1255_v27 = vmul.f32 %v1223_v41, %v1195_v12  ;;  %v898_v10 = vadd.f32 %v1808_v9, %v2947_v2 }
 0x1a3   : > { %v889_v43 = vpop.f32.mrf.mxu1 }
 0x1a4   : > { %v1253_v49 = vmul.f32 %v1221_v11, %v1195_v12  ;;  %v890_v58 = vadd.f32 %v2947_v2, %v889_v43  ;;  %v1273_v32 = vpack.c.bf16 %v1255_v27, %v1254_v57  ;;  %v1226_v53 = vmax.f32 %v898_v10, 0.0 }
 0x1a5   : > { %v1809_v22 = vpop.f32.mrf.mxu1 }
 0x1a6   : > { %v901_v23 = vadd.f32 %v1809_v22, %v2947_v2  ;;  %v1272_v62 = vpack.c.bf16 %v1253_v49, %v1252_v1  ;;  %v1224_v40 = vmax.f32 %v890_v58, 0.0  ;;  %v1258_v29 = vmul.f32 %v1226_v53, %v1195_v12 }
 0x1a7   : > { %v892_v34 = vpop.f32.mrf.mxu1 }
 0x1a8   : > { %v1227_v31 = vmax.f32 %v901_v23, 0.0  ;;  %v893_v37 = vadd.f32 %v2947_v2, %v892_v34  ;;  %1850 = vmatprep.mubr.bf16.mxu0 %v1272_v62  ;;  %v1256_v28 = vmul.f32 %v1224_v40, %v1195_v12 }
 0x1a9   : > { %1851 = vmatmul.mubr.bf16.gmra.mxu0 %v1273_v32 }
 0x1aa   : > { %v1225_v35 = vmax.f32 %v893_v37, 0.0  ;;  %v1259_v5 = vmul.f32 %v1227_v31, %v1195_v12 }
 0x1ac   : > { %v1257_v39 = vmul.f32 %v1225_v35, %v1195_v12  ;;  %v1275_v17 = vpack.c.bf16 %v1259_v5, %v1258_v29 }
 0x1ae   : > { %v1274_v61 = vpack.c.bf16 %v1257_v39, %v1256_v28 }
 0x1b0   : > { %1854 = vmatprep.mubr.bf16.mxu0 %v1274_v61 }
 0x1b1   : > { %1855 = vmatmul.mubr.bf16.gmra.mxu0 %v1275_v17 }
 0x239   : > { %v1828_v2 = vpop.f32.mrf.mxu0 }
 0x23a   : > { %v1350_v44 = vadd.f32 %v1828_v2, %v3007_v13 }
 0x23b   : > { %v1341_v50 = vpop.f32.mrf.mxu0 }
 0x23c   : > { %1470 = vst [vmem:[%s3012_s10 + $0x10] sm:$0xff] %v1350_v44  ;;  %v1342_v15 = vadd.f32 %v3007_v13, %v1341_v50 }
 0x23d   : > { %v1829_v19 = vpop.f32.mrf.mxu0 }
 0x23e   : > { %1468 = vst [vmem:[%s3012_s10] sm:$0xff] %v1342_v15  ;;  %v1353_v26 = vadd.f32 %v1829_v19, %v3007_v13 }
 0x23f   : > { %v1344_v60 = vpop.f32.mrf.mxu0 }
 0x240   : > { %1471 = vst [vmem:[%s3012_s10 + $0x18] sm:$0xff] %v1353_v26  ;;  %v1345_v56 = vadd.f32 %v3007_v13, %v1344_v60 }
 0x241   : > { %v1832_v47 = vpop.f32.mrf.mxu0 }
 0x242   : > { %1469 = vst [vmem:[%s3012_s10 + $0x8] sm:$0xff] %v1345_v56  ;;  %v1366_v20 = vadd.f32 %v1832_v47, %v3007_v13 }
 0x243   : > { %v1357_v55 = vpop.f32.mrf.mxu0 }
 0x244   : > { %1474 = vst [vmem:[%s3012_s10 + $0x30] sm:$0xff] %v1366_v20  ;;  %v1358_v8 = vadd.f32 %v3007_v13, %v1357_v55 }
 0x245   : > { %v1833_v38 = vpop.f32.mrf.mxu0 }
 0x246   : > { %1472 = vst [vmem:[%s3012_s10 + $0x20] sm:$0xff] %v1358_v8  ;;  %v1369_v63 = vadd.f32 %v1833_v38, %v3007_v13 }
 0x247   : > { %v1360_v30 = vpop.f32.mrf.mxu0 }
 0x248   : > { %1475 = vst [vmem:[%s3012_s10 + $0x38] sm:$0xff] %v1369_v63  ;;  %v1361_v24 = vadd.f32 %v3007_v13, %v1360_v30 }
 0x249   : > { %v1836_v7 = vpop.f32.mrf.mxu0 }
 0x24a   : > { %1473 = vst [vmem:[%s3012_s10 + $0x28] sm:$0xff] %v1361_v24  ;;  %v1382_v16 = vadd.f32 %v1836_v7, %v3007_v13 }
 0x24b   : > { %v1373_v3 = vpop.f32.mrf.mxu0 }
 0x24c   : > { %1478 = vst [vmem:[%s3012_s10 + $0x50] sm:$0xff] %v1382_v16  ;;  %v1374_v46 = vadd.f32 %v3007_v13, %v1373_v3 }
 0x24d   : > { %v1837_v6 = vpop.f32.mrf.mxu0 }
 0x24e   : > { %1476 = vst [vmem:[%s3012_s10 + $0x40] sm:$0xff] %v1374_v46  ;;  %v1385_v48 = vadd.f32 %v1837_v6, %v3007_v13 }
 0x24f   : > { %v1376_v14 = vpop.f32.mrf.mxu0 }
 0x250   : > { %1479 = vst [vmem:[%s3012_s10 + $0x58] sm:$0xff] %v1385_v48  ;;  %v1377_v18 = vadd.f32 %v3007_v13, %v1376_v14 }
 0x251   : > { %v1840_v59 = vpop.f32.mrf.mxu0 }
 0x252   : > { %1477 = vst [vmem:[%s3012_s10 + $0x48] sm:$0xff] %v1377_v18  ;;  %v1398_v52 = vadd.f32 %v1840_v59, %v3007_v13 }
 0x253   : > { %v1389_v0 = vpop.f32.mrf.mxu0 }
 0x254   : > { %1482 = vst [vmem:[%s3012_s10 + $0x70] sm:$0xff] %v1398_v52  ;;  %v1390_v4 = vadd.f32 %v3007_v13, %v1389_v0 }
 0x255   : > { %v1841_v54 = vpop.f32.mrf.mxu0 }
 0x256   : > { %1480 = vst [vmem:[%s3012_s10 + $0x60] sm:$0xff] %v1390_v4  ;;  %v1401_v45 = vadd.f32 %v1841_v54, %v3007_v13 }
 0x257   : > { %v1392_v33 = vpop.f32.mrf.mxu0 }
 0x258   : > { %1483 = vst [vmem:[%s3012_s10 + $0x78] sm:$0xff] %v1401_v45  ;;  %v1393_v25 = vadd.f32 %v3007_v13, %v1392_v33 }
 0x259   : > { %v1844_v21 = vpop.f32.mrf.mxu0 }
 0x25a   : > { %1481 = vst [vmem:[%s3012_s10 + $0x68] sm:$0xff] %v1393_v25  ;;  %v1414_v41 = vadd.f32 %v1844_v21, %v3007_v13 }
 0x25b   : > { %v1405_v36 = vpop.f32.mrf.mxu0 }
 0x25c   : > { %1486 = vst [vmem:[%s3012_s10 + $0x90] sm:$0xff] %v1414_v41  ;;  %v1406_v51 = vadd.f32 %v3007_v13, %v1405_v36 }
 0x25d   : > { %v1845_v9 = vpop.f32.mrf.mxu0 }
 0x25e   : > { %1484 = vst [vmem:[%s3012_s10 + $0x80] sm:$0xff] %v1406_v51  ;;  %v1417_v12 = vadd.f32 %v1845_v9, %v3007_v13 }
 0x25f   : > { %v1408_v42 = vpop.f32.mrf.mxu0 }
 0x260   : > { %1487 = vst [vmem:[%s3012_s10 + $0x98] sm:$0xff] %v1417_v12  ;;  %v1409_v11 = vadd.f32 %v3007_v13, %v1408_v42 }
 0x261   : > { %v1848_v43 = vpop.f32.mrf.mxu0 }
 0x262   : > { %1485 = vst [vmem:[%s3012_s10 + $0x88] sm:$0xff] %v1409_v11  ;;  %v1430_v1 = vadd.f32 %v1848_v43, %v3007_v13 }
 0x263   : > { %v1421_v27 = vpop.f32.mrf.mxu0 }
 0x264   : > { %1490 = vst [vmem:[%s3012_s10 + $0xb0] sm:$0xff] %v1430_v1  ;;  %v1422_v49 = vadd.f32 %v3007_v13, %v1421_v27 }
 0x265   : > { %v1849_v58 = vpop.f32.mrf.mxu0 }
 0x266   : > { %1488 = vst [vmem:[%s3012_s10 + $0xa0] sm:$0xff] %v1422_v49  ;;  %v1433_v22 = vadd.f32 %v1849_v58, %v3007_v13 }
 0x267   : > { %v1424_v57 = vpop.f32.mrf.mxu0 }
 0x268   : > { %1491 = vst [vmem:[%s3012_s10 + $0xb8] sm:$0xff] %v1433_v22  ;;  %v1425_v10 = vadd.f32 %v3007_v13, %v1424_v57 }
 0x269   : > { %v1852_v23 = vpop.f32.mrf.mxu0 }
 0x26a   : > { %1489 = vst [vmem:[%s3012_s10 + $0xa8] sm:$0xff] %v1425_v10  ;;  %v1446_v62 = vadd.f32 %v1852_v23, %v3007_v13 }
 0x26b   : > { %v1437_v34 = vpop.f32.mrf.mxu0 }
 0x26c   : > { %1494 = vst [vmem:[%s3012_s10 + $0xd0] sm:$0xff] %v1446_v62  ;;  %v1438_v40 = vadd.f32 %v3007_v13, %v1437_v34 }
 0x26d   : > { %v1853_v31 = vpop.f32.mrf.mxu0 }
 0x26e   : > { %1492 = vst [vmem:[%s3012_s10 + $0xc0] sm:$0xff] %v1438_v40  ;;  %v1449_v37 = vadd.f32 %v1853_v31, %v3007_v13 }
 0x26f   : > { %v1440_v32 = vpop.f32.mrf.mxu0 }
 0x270   : > { %1495 = vst [vmem:[%s3012_s10 + $0xd8] sm:$0xff] %v1449_v37  ;;  %v1441_v53 = vadd.f32 %v3007_v13, %v1440_v32 }
 0x271   : > { %v1856_v35 = vpop.f32.mrf.mxu0 }
 0x272   : > { %1493 = vst [vmem:[%s3012_s10 + $0xc8] sm:$0xff] %v1441_v53  ;;  %v1462_v28 = vadd.f32 %v1856_v35, %v3007_v13 }
 0x273   : > { %v1453_v5 = vpop.f32.mrf.mxu0 }
 0x274   : > { %1498 = vst [vmem:[%s3012_s10 + $0xf0] sm:$0xff] %v1462_v28  ;;  %v1454_v39 = vadd.f32 %v3007_v13, %v1453_v5 }
 0x275   : > { %v1857_v29 = vpop.f32.mrf.mxu0 }
 0x276   : > { %1496 = vst [vmem:[%s3012_s10 + $0xe0] sm:$0xff] %v1454_v39  ;;  %v1465_v61 = vadd.f32 %v1857_v29, %v3007_v13 }
 0x277   : > { %v1456_v17 = vpop.f32.mrf.mxu0 }
 0x278   : > { %1499 = vst [vmem:[%s3012_s10 + $0xf8] sm:$0xff] %v1465_v61  ;;  %v1457_v2 = vadd.f32 %v3007_v13, %v1456_v17 }
 0x27a   : > { %1497 = vst [vmem:[%s3012_s10 + $0xe8] sm:$0xff] %v1457_v2 }
 0x27b   : > { %2146 = shalt.err (!%p2143_p10)
}
 0x27c   : > { %s2147_s16 = scalar_lea.hbm %s3079_s21, 4096  ;;  %s2151_s26 = scalar_lea.hbm %s3135_s8, 8192 }
 0x27d   : > { %p2148_p6 = scmp.ne.s32.totalorder %s3079_s21, %s2147_s16  ;;  %p2152_p3 = scmp.lt.s32.totalorder %s3079_s21, %s3135_s8 }
 0x27e   : > { %p2153_p11 = scmp.lt.s32.totalorder %s2151_s26, %s2147_s16 }
 0x27f   : > { %p2149_p4 = pnand %p2148_p6, %p3160_p1 }
 0x280   : > { %p2154_p5 = por %p2153_p11, %p2152_p3 }
 0x281   : > { %p2150_p8 = pneg %p2149_p4 }
 0x283   : > { %p2155_p7 = pnand %p2154_p5, %p2150_p8 }
 0x285   : > { %2158 = shalt.err (!%p2155_p7)
}
 0x286   : > { %s2214_s4 = smov 128   ;;  %s2215_s20 = smov 8  }
 0x287   : > { %1888 = dma.vmem_to_hbm [thread:$0]  (%p3160_p1), %s3081_s14, 4096, %s3079_s21, %s1501_s9, %s2214_s4, %s2214_s4, %s2215_s20  }
 0x288 PF: > { %s1529_s11 = sand.u32 1, %s2193_s27   ;;  %p3161_p12 = scmp.ne.s32.totalorder %s3145_s12, 0 }
 0x289   : > { %p3162_p9 = scmp.ge.s32.totalorder %s2205_s30, 2  ;;  %s1530_s13 = scalar_lea.sflag [#allocation4], %s1529_s11 }
 0x28b   : > { %p1905_p13 = pnand %p3162_p9, %p3161_p12 }
 0x28d   : > { %p1906_p0 = pneg %p1905_p13 }
 0x28f   : > { %2188 = dma.done.wait (%p1906_p0), %s1530_s13, 4096  }
 0x290   : > { %2190 = vsyncadd (%p1906_p0), %s1530_s13, 4294963200  ;;  %p23_p2 = scmp.ge.s32.totalorder %s2350_s18, 4   ;;  %s3163_s27 = smov %s2197_s28 }
 0x291   : > { %s3164_s28 = smov %s2201_s29  ;;  %s3165_s29 = smov %s2360_s24 }
 0x292   : > { %s3166_s30 = smov %s2350_s18  ;;  %25 = sbr.rel (!%p23_p2) target bundleno = 10 (0xa), region = 109 }
 0x297   :  { %1535 = vsyncpa [#allocation3], 1 }
 0x298   :  { %1537 = vsyncpa [#allocation3 + $0x1], 1 }
 0x299   :  { %1538 = vsyncpa [#allocation6], 1 }
 0x29a   :  { %1539 = vsyncpa [#allocation9], 1 }
 0x29b   :  { %1540 = vsyncpa [#allocation4], 1 }
 0x29c   :  { %1542 = vsyncpa [#allocation4 + $0x1], 1 }

</bundles_post_ra>
